<compile_context>
chip_gen: v7x
topology: tpu7x:2x2x1
jax: 0.10.0
libtpu: 0.0.40
codegen_flags: <defaults>
</compile_context>

<pallas_src>
import functools
import math

import jax
import jax.numpy as jnp
from jax.experimental import pallas as pl
from jax.experimental.pallas import tpu as pltpu


def _dyn_exp_kernel(eps, num_exp, cdt,
                    x_ref, qemb_ref, bemb_ref, mask_ref, maskT_ref,
                    wx_ref, bx_ref, a1W_ref, a1b_ref, b1W_ref, b1b_ref,
                    out_ref):
    Bt, L, d = x_ref.shape
    E = num_exp
    N = Bt * L

    # ---- fused token-wise linears: [cond | key/sqrt(d) | a | b | sel] ------
    x2d = x_ref[...].reshape(N, d)
    h = jnp.dot(x2d.astype(cdt), wx_ref[...],
                preferred_element_type=jnp.float32) + bx_ref[...]
    cond = h[:, 0 * d:1 * d]
    x_key = h[:, 1 * d:2 * d]          # 1/sqrt(d) already folded into weights
    a_emb = h[:, 2 * d:3 * d]
    b_emb = h[:, 3 * d:4 * d]
    sel = jax.nn.sigmoid(h[:, 4 * d:5 * d])

    # gating linears (a1 / b1)
    a_attn = jnp.dot(a_emb.astype(cdt), a1W_ref[...],
                     preferred_element_type=jnp.float32) + a1b_ref[...]
    a_emb = a_emb * jax.nn.sigmoid(a_attn)
    b_attn = jnp.dot(b_emb.astype(cdt), b1W_ref[...],
                     preferred_element_type=jnp.float32) + b1b_ref[...]
    b_emb = b_emb * jax.nn.sigmoid(b_attn)

    cond_b = cond.reshape(Bt, L, d)
    xkey_b = x_key.reshape(Bt, L, d)
    a_emb_b = a_emb.reshape(Bt, L, d)
    b_emb_b = b_emb.reshape(Bt, L, d)
    sel_b = sel.reshape(Bt, L, d)

    qemb = qemb_ref[...]          # (Bt, E, d)
    bemb = bemb_ref[...]          # (Bt, E, d)
    mask = mask_ref[...]          # (Bt, L, L)  0/1 float
    maskT = maskT_ref[...]        # (Bt, L, L)  mask transposed per batch

    # (E, L)-major row ordering: row r = e*L + l  (contiguous merge, no
    # interleaving relayout).  A permutation of the contracted L*E axis, so
    # results are identical to the (l*E + e) ordering of the PyTorch module.
    query_exp = (qemb[:, :, None, :] + cond_b[:, None, :, :]).reshape(Bt, E * L, d)
    bias_exp = (bemb[:, :, None, :] + cond_b[:, None, :, :]).reshape(Bt, E * L, d)

    z = jnp.einsum('brd,bjd->brj', query_exp.astype(cdt), xkey_b.astype(cdt),
                   preferred_element_type=jnp.float32)          # (Bt, E*L, L)
    # TODO(synk): all Dropout layers are identity (eval mode / p = 0).

    # ---- forward ("fw") attention ------------------------------------------
    mm_fw = jnp.tile(mask, (1, E, 1))                            # (Bt, E*L, L)
    a_fw = jnp.maximum(z, 0.0) * mm_fw
    b_fw = jnp.maximum(-z, 0.0) * mm_fw
    a_fw = a_fw * pl.reciprocal(jnp.sum(a_fw, axis=-1, keepdims=True) + eps,
                                approx=True)
    b_fw = b_fw * pl.reciprocal(jnp.sum(b_fw, axis=-1, keepdims=True) + eps,
                                approx=True)

    class_a = jnp.einsum('brj,bjd->brd', a_fw.astype(cdt), a_emb_b.astype(cdt),
                         preferred_element_type=jnp.float32) + bias_exp
    class_b = jnp.einsum('brj,bjd->brd', b_fw.astype(cdt), b_emb_b.astype(cdt),
                         preferred_element_type=jnp.float32) + bias_exp

    # ---- backward ("bw") attention, no explicit transpose -------------------
    # weights kept in (E*L, L) layout: W[b, e*L+j, i] = relu(+-z) * mask[b,i,j],
    # normalized over the (E*L) axis (column sums), then contracted over that
    # axis against (class + bias_exp).
    mm_bw = jnp.tile(maskT, (1, E, 1))                           # (Bt, E*L, L)
    a_bw = jnp.maximum(z, 0.0) * mm_bw
    b_bw = jnp.maximum(-z, 0.0) * mm_bw
    a_bw = a_bw * pl.reciprocal(jnp.sum(a_bw, axis=1, keepdims=True) + eps,
                                approx=True)
    b_bw = b_bw * pl.reciprocal(jnp.sum(b_bw, axis=1, keepdims=True) + eps,
                                approx=True)

    # NOTE: bias_exp is intentionally added twice (once inside class_a/b, once
    # here) -- this matches the PyTorch module exactly.
    out_a = jnp.einsum('bri,brd->bid', a_bw.astype(cdt),
                       (class_a + bias_exp).astype(cdt),
                       preferred_element_type=jnp.float32)
    out_b = jnp.einsum('bri,brd->bid', b_bw.astype(cdt),
                       (class_b + bias_exp).astype(cdt),
                       preferred_element_type=jnp.float32)

    out_ref[...] = (sel_b * out_a + (1.0 - sel_b) * out_b).astype(out_ref.dtype)


def dynamic_expansion_block(x, qemb, bemb, mask, params, *, num_exp, eps,
                            block_bs=None, compute_dtype=jnp.bfloat16):
    """x: (bs, L, d); qemb/bemb: (bs, E, d); mask: (bs, L, L) float 0/1."""
    bs, L, d = x.shape
    E = num_exp

    # Batch tile per grid step (keep the grid length >= 2 when possible so the
    # "parallel" axis shards across both TensorCores on v7x).
    if block_bs is None:
        block_bs = max(1, min(bs // 2, 8))
        while bs % block_bs:
            block_bs -= 1
    assert bs % block_bs == 0, "bs must be divisible by block_bs"
    Bt = block_bs

    inv_sqrt_d = 1.0 / math.sqrt(d)
    # Fuse the five x-consuming linears into a single (d, 5d) weight; fold the
    # attention scale into the key block offline.
    w_x5 = jnp.concatenate(
        [params["cond_W"], params["key_W"] * inv_sqrt_d,
         params["a_W"], params["b_W"], params["sel_W"]],
        axis=1).astype(compute_dtype)
    b_x5 = jnp.concatenate(
        [params["cond_b"], params["key_b"] * inv_sqrt_d,
         params["a_b"], params["b_b"], params["sel_b"]],
        axis=1).astype(jnp.float32)
    a1W = params["a1_W"].astype(compute_dtype)
    a1b = params["a1_b"].astype(jnp.float32)
    b1W = params["b1_W"].astype(compute_dtype)
    b1b = params["b1_b"].astype(jnp.float32)

    # Pre-transposed mask (glue, outside the kernel) so the backward path needs
    # no in-kernel transpose at all.
    maskT = jnp.swapaxes(mask, 1, 2)

    kernel = functools.partial(_dyn_exp_kernel, float(eps), E, compute_dtype)

    batched = lambda i: (i, 0, 0)
    const2d = lambda i: (0, 0)

    in_specs = [
        pl.BlockSpec((Bt, L, d), batched),     # x
        pl.BlockSpec((Bt, E, d), batched),     # query embedding rows
        pl.BlockSpec((Bt, E, d), batched),     # bias embedding rows
        pl.BlockSpec((Bt, L, L), batched),     # mask
        pl.BlockSpec((Bt, L, L), batched),     # mask^T
        pl.BlockSpec((d, 5 * d), const2d),     # fused x-linear weights
        pl.BlockSpec((1, 5 * d), const2d),     # fused x-linear biases
        pl.BlockSpec((d, d), const2d),         # a1 W
        pl.BlockSpec((1, d), const2d),         # a1 b
        pl.BlockSpec((d, d), const2d),         # b1 W
        pl.BlockSpec((1, d), const2d),         # b1 b
    ]

    grid_spec = pltpu.PrefetchScalarGridSpec(
        num_scalar_prefetch=0,
        grid=(bs // Bt,),
        in_specs=in_specs,
        out_specs=pl.BlockSpec((Bt, L, d), batched),
    )

    return pl.pallas_call(
        kernel,
        out_shape=jax.ShapeDtypeStruct((bs, L, d), jnp.float32),
        grid_spec=grid_spec,
        compiler_params=pltpu.CompilerParams(
            dimension_semantics=("parallel",),
            vmem_limit_bytes=32 * 1024 * 1024),
    )(x, qemb, bemb, mask, maskT, w_x5, b_x5, a1W, a1b, b1W, b1b)


def reference_jax(x, qemb, bemb, mask, params, *, num_exp, eps):
    """Pure-JAX f32 mirror of the PyTorch forward (dropout = identity)."""
    bs, L, d = x.shape
    E = num_exp

    def lin(v, name):
        return v @ params[name + "_W"] + params[name + "_b"]

    cond = lin(x, "cond")
    query_exp = (qemb[:, None, :, :] + cond[:, :, None, :]).reshape(bs, L * E, d)
    bias_exp = (bemb[:, None, :, :] + cond[:, :, None, :]).reshape(bs, L * E, d)
    x_key = lin(x, "key")
    z = jnp.matmul(query_exp, jnp.swapaxes(x_key, -1, -2)) / (d ** 0.5)

    mm1 = jnp.broadcast_to(mask[:, :, None, :], (bs, L, E, L)).reshape(bs, L * E, L)
    a_fw = jnp.where(mm1 == 0.0, 0.0, jnp.maximum(z, 0.0))
    b_fw = jnp.where(mm1 == 0.0, 0.0, jnp.maximum(-z, 0.0))
    a_fw = a_fw / (a_fw.sum(-1, keepdims=True) + eps)
    b_fw = b_fw / (b_fw.sum(-1, keepdims=True) + eps)

    a_e = lin(x, "a")
    a_e = a_e * jax.nn.sigmoid(lin(a_e, "a1"))
    b_e = lin(x, "b")
    b_e = b_e * jax.nn.sigmoid(lin(b_e, "b1"))

    class_a = jnp.matmul(a_fw, a_e) + bias_exp
    class_b = jnp.matmul(b_fw, b_e) + bias_exp

    mm2 = jnp.broadcast_to(mask[:, :, :, None], (bs, L, L, E)).reshape(bs, L, L * E)
    zT = jnp.swapaxes(z, -1, -2)
    a_bw = jnp.where(mm2 == 0.0, 0.0, jnp.maximum(zT, 0.0))
    b_bw = jnp.where(mm2 == 0.0, 0.0, jnp.maximum(-zT, 0.0))
    a_bw = a_bw / (a_bw.sum(-1, keepdims=True) + eps)
    b_bw = b_bw / (b_bw.sum(-1, keepdims=True) + eps)

    class_a = jnp.matmul(a_bw, class_a + bias_exp)
    class_b = jnp.matmul(b_bw, class_b + bias_exp)

    selector = jax.nn.sigmoid(lin(x, "sel"))
    return selector * class_a + (1.0 - selector) * class_b


if __name__ == "__main__":
    bs, dec_len, d_model, num_exp = 4, 8, 32, 4
    eps = 1e-9

    key = jax.random.PRNGKey(0)
    keys = jax.random.split(key, 24)
    ki = iter(keys)

    # Deterministic parameter init (weights pre-transposed: y = x @ W + b).
    scale = 1.0 / math.sqrt(d_model)
    params = {}
    for name in ("cond", "key", "a", "a1", "b", "b1", "sel"):
        params[name + "_W"] = jax.random.uniform(
            next(ki), (d_model, d_model), jnp.float32, -scale, scale)
        params[name + "_b"] = jax.random.uniform(
            next(ki), (1, d_model), jnp.float32, -scale, scale)

    query_table = jax.random.normal(next(ki), (num_exp, d_model), jnp.float32)
    bias_table = jax.random.normal(next(ki), (num_exp, d_model), jnp.float32)

    x = jax.random.normal(next(ki), (bs, dec_len, d_model), jnp.float32)
    n_indexes = jnp.tile(jnp.arange(num_exp, dtype=jnp.int32)[None, :], (bs, 1))
    # causal 0/1 mask (bs, dec_len, dec_len)
    mask = jnp.tril(jnp.ones((dec_len, dec_len), jnp.float32))
    mask = jnp.broadcast_to(mask[None], (bs, dec_len, dec_len))

    # embedding lookup is glue (gather), done outside the kernel
    qemb = query_table[n_indexes]   # (bs, num_exp, d_model)
    bemb = bias_table[n_indexes]    # (bs, num_exp, d_model)

    out = dynamic_expansion_block(x, qemb, bemb, mask, params,
                                  num_exp=num_exp, eps=eps, block_bs=2)
    out = jax.block_until_ready(out)

    ref = reference_jax(x, qemb, bemb, mask, params, num_exp=num_exp, eps=eps)
    assert out.shape == (bs, dec_len, d_model)
    # bf16 matmul inputs + approx reciprocal => slightly looser tolerance.
    assert jnp.allclose(out, ref, atol=5e-2, rtol=5e-2), \
        f"max abs err {jnp.max(jnp.abs(out - ref))}"

    print("KERNEL_OK")
</pallas_src>

<mosaic_0001>
module attributes {stable_mosaic.version = 11 : i64} {
  func.func @_dyn_exp_kernel(%arg0: i32, %arg1: memref<2x8x32xf32, #tpu.memory_space<vmem>>, %arg2: memref<2x4x32xf32, #tpu.memory_space<vmem>>, %arg3: memref<2x4x32xf32, #tpu.memory_space<vmem>>, %arg4: memref<2x8x8xf32, #tpu.memory_space<vmem>>, %arg5: memref<2x8x8xf32, #tpu.memory_space<vmem>>, %arg6: memref<32x160xbf16, #tpu.memory_space<vmem>>, %arg7: memref<1x160xf32, #tpu.memory_space<vmem>>, %arg8: memref<32x32xbf16, #tpu.memory_space<vmem>>, %arg9: memref<1x32xf32, #tpu.memory_space<vmem>>, %arg10: memref<32x32xbf16, #tpu.memory_space<vmem>>, %arg11: memref<1x32xf32, #tpu.memory_space<vmem>>, %arg12: memref<2x8x32xf32, #tpu.memory_space<vmem>>) attributes {dimension_semantics = [#tpu.dimension_semantics<parallel>], iteration_bounds = array<i64: 2>, scalar_prefetch = 0 : i64, scratch_operands = 0 : i64, tpu.core_type = #tpu.core_type<tc>, window_params = [{transform_indices = @transform_0, window_bounds = array<i64: 2, 8, 32>}, {transform_indices = @transform_1, window_bounds = array<i64: 2, 4, 32>}, {transform_indices = @transform_2, window_bounds = array<i64: 2, 4, 32>}, {transform_indices = @transform_3, window_bounds = array<i64: 2, 8, 8>}, {transform_indices = @transform_4, window_bounds = array<i64: 2, 8, 8>}, {pipeline_mode = #tpu.pipeline_mode<synchronous>, transform_indices = @transform_5, window_bounds = array<i64: 32, 160>}, {pipeline_mode = #tpu.pipeline_mode<synchronous>, transform_indices = @transform_6, window_bounds = array<i64: 1, 160>}, {pipeline_mode = #tpu.pipeline_mode<synchronous>, transform_indices = @transform_7, window_bounds = array<i64: 32, 32>}, {pipeline_mode = #tpu.pipeline_mode<synchronous>, transform_indices = @transform_8, window_bounds = array<i64: 1, 32>}, {pipeline_mode = #tpu.pipeline_mode<synchronous>, transform_indices = @transform_9, window_bounds = array<i64: 32, 32>}, {pipeline_mode = #tpu.pipeline_mode<synchronous>, transform_indices = @transform_10, window_bounds = array<i64: 1, 32>}, {transform_indices = @transform_11, window_bounds = array<i64: 2, 8, 32>}]} {
    %c0 = arith.constant 0 : index
    %c0_0 = arith.constant 0 : index
    %c0_1 = arith.constant 0 : index
    %0 = vector.load %arg1[%c0, %c0_0, %c0_1] : memref<2x8x32xf32, #tpu.memory_space<vmem>>, vector<2x8x32xf32>
    %1 = vector.shape_cast %0 : vector<2x8x32xf32> to vector<16x32xf32>
    %2 = arith.truncf %1 : vector<16x32xf32> to vector<16x32xbf16>
    %c0_2 = arith.constant 0 : index
    %c0_3 = arith.constant 0 : index
    %3 = vector.load %arg6[%c0_2, %c0_3] : memref<32x160xbf16, #tpu.memory_space<vmem>>, vector<32x160xbf16>
    %cst = arith.constant dense<0.000000e+00> : vector<16x160xf32>
    %4 = tpu.matmul %2, %3, %cst {dimension_numbers = #tpu.dot_dimension_numbers<[1], [0], [0], [1], [0, 0, 1, 1], [], []>} : vector<16x32xbf16>, vector<32x160xbf16>, vector<16x160xf32> -> vector<16x160xf32>
    %c0_4 = arith.constant 0 : index
    %c0_5 = arith.constant 0 : index
    %5 = vector.load %arg7[%c0_4, %c0_5] : memref<1x160xf32, #tpu.memory_space<vmem>>, vector<1x160xf32>
    %6 = vector.broadcast %5 : vector<1x160xf32> to vector<16x160xf32>
    %7 = arith.addf %4, %6 : vector<16x160xf32>
    %8 = vector.extract_strided_slice %7 {offsets = [0, 0], sizes = [16, 32], strides = [1, 1]} : vector<16x160xf32> to vector<16x32xf32>
    %9 = vector.extract_strided_slice %7 {offsets = [0, 32], sizes = [16, 32], strides = [1, 1]} : vector<16x160xf32> to vector<16x32xf32>
    %10 = vector.extract_strided_slice %7 {offsets = [0, 64], sizes = [16, 32], strides = [1, 1]} : vector<16x160xf32> to vector<16x32xf32>
    %11 = vector.extract_strided_slice %7 {offsets = [0, 96], sizes = [16, 32], strides = [1, 1]} : vector<16x160xf32> to vector<16x32xf32>
    %12 = vector.extract_strided_slice %7 {offsets = [0, 128], sizes = [16, 32], strides = [1, 1]} : vector<16x160xf32> to vector<16x32xf32>
    %13 = arith.negf %12 : vector<16x32xf32>
    %14 = math.exp %13 : vector<16x32xf32>
    %cst_6 = arith.constant 1.000000e+00 : f32
    %15 = vector.broadcast %cst_6 : f32 to vector<16x32xf32>
    %16 = arith.addf %15, %14 : vector<16x32xf32>
    %17 = arith.divf %15, %16 : vector<16x32xf32>
    %18 = arith.truncf %10 : vector<16x32xf32> to vector<16x32xbf16>
    %c0_7 = arith.constant 0 : index
    %c0_8 = arith.constant 0 : index
    %19 = vector.load %arg8[%c0_7, %c0_8] : memref<32x32xbf16, #tpu.memory_space<vmem>>, vector<32x32xbf16>
    %cst_9 = arith.constant dense<0.000000e+00> : vector<16x32xf32>
    %20 = tpu.matmul %18, %19, %cst_9 {dimension_numbers = #tpu.dot_dimension_numbers<[1], [0], [0], [1], [0, 0, 1, 1], [], []>} : vector<16x32xbf16>, vector<32x32xbf16>, vector<16x32xf32> -> vector<16x32xf32>
    %c0_10 = arith.constant 0 : index
    %c0_11 = arith.constant 0 : index
    %21 = vector.load %arg9[%c0_10, %c0_11] : memref<1x32xf32, #tpu.memory_space<vmem>>, vector<1x32xf32>
    %22 = vector.broadcast %21 : vector<1x32xf32> to vector<16x32xf32>
    %23 = arith.addf %20, %22 : vector<16x32xf32>
    %24 = arith.negf %23 : vector<16x32xf32>
    %25 = math.exp %24 : vector<16x32xf32>
    %cst_12 = arith.constant 1.000000e+00 : f32
    %26 = vector.broadcast %cst_12 : f32 to vector<16x32xf32>
    %27 = arith.addf %26, %25 : vector<16x32xf32>
    %28 = arith.divf %26, %27 : vector<16x32xf32>
    %29 = arith.mulf %10, %28 : vector<16x32xf32>
    %30 = arith.truncf %11 : vector<16x32xf32> to vector<16x32xbf16>
    %c0_13 = arith.constant 0 : index
    %c0_14 = arith.constant 0 : index
    %31 = vector.load %arg10[%c0_13, %c0_14] : memref<32x32xbf16, #tpu.memory_space<vmem>>, vector<32x32xbf16>
    %cst_15 = arith.constant dense<0.000000e+00> : vector<16x32xf32>
    %32 = tpu.matmul %30, %31, %cst_15 {dimension_numbers = #tpu.dot_dimension_numbers<[1], [0], [0], [1], [0, 0, 1, 1], [], []>} : vector<16x32xbf16>, vector<32x32xbf16>, vector<16x32xf32> -> vector<16x32xf32>
    %c0_16 = arith.constant 0 : index
    %c0_17 = arith.constant 0 : index
    %33 = vector.load %arg11[%c0_16, %c0_17] : memref<1x32xf32, #tpu.memory_space<vmem>>, vector<1x32xf32>
    %34 = vector.broadcast %33 : vector<1x32xf32> to vector<16x32xf32>
    %35 = arith.addf %32, %34 : vector<16x32xf32>
    %36 = arith.negf %35 : vector<16x32xf32>
    %37 = math.exp %36 : vector<16x32xf32>
    %cst_18 = arith.constant 1.000000e+00 : f32
    %38 = vector.broadcast %cst_18 : f32 to vector<16x32xf32>
    %39 = arith.addf %38, %37 : vector<16x32xf32>
    %40 = arith.divf %38, %39 : vector<16x32xf32>
    %41 = arith.mulf %11, %40 : vector<16x32xf32>
    %42 = vector.shape_cast %8 : vector<16x32xf32> to vector<2x8x32xf32>
    %43 = vector.shape_cast %9 : vector<16x32xf32> to vector<2x8x32xf32>
    %44 = vector.shape_cast %29 : vector<16x32xf32> to vector<2x8x32xf32>
    %45 = vector.shape_cast %41 : vector<16x32xf32> to vector<2x8x32xf32>
    %46 = vector.shape_cast %17 : vector<16x32xf32> to vector<2x8x32xf32>
    %c0_19 = arith.constant 0 : index
    %c0_20 = arith.constant 0 : index
    %c0_21 = arith.constant 0 : index
    %47 = vector.load %arg2[%c0_19, %c0_20, %c0_21] : memref<2x4x32xf32, #tpu.memory_space<vmem>>, vector<2x4x32xf32>
    %c0_22 = arith.constant 0 : index
    %c0_23 = arith.constant 0 : index
    %c0_24 = arith.constant 0 : index
    %48 = vector.load %arg3[%c0_22, %c0_23, %c0_24] : memref<2x4x32xf32, #tpu.memory_space<vmem>>, vector<2x4x32xf32>
    %c0_25 = arith.constant 0 : index
    %c0_26 = arith.constant 0 : index
    %c0_27 = arith.constant 0 : index
    %49 = vector.load %arg4[%c0_25, %c0_26, %c0_27] : memref<2x8x8xf32, #tpu.memory_space<vmem>>, vector<2x8x8xf32>
    %c0_28 = arith.constant 0 : index
    %c0_29 = arith.constant 0 : index
    %c0_30 = arith.constant 0 : index
    %50 = vector.load %arg5[%c0_28, %c0_29, %c0_30] : memref<2x8x8xf32, #tpu.memory_space<vmem>>, vector<2x8x8xf32>
    %51 = vector.shape_cast %47 : vector<2x4x32xf32> to vector<2x4x1x32xf32>
    %52 = vector.shape_cast %42 : vector<2x8x32xf32> to vector<2x1x8x32xf32>
    %53 = vector.broadcast %51 : vector<2x4x1x32xf32> to vector<2x4x8x32xf32>
    %54 = vector.broadcast %52 : vector<2x1x8x32xf32> to vector<2x4x8x32xf32>
    %55 = arith.addf %53, %54 : vector<2x4x8x32xf32>
    %56 = vector.shape_cast %55 : vector<2x4x8x32xf32> to vector<2x32x32xf32>
    %57 = vector.shape_cast %48 : vector<2x4x32xf32> to vector<2x4x1x32xf32>
    %58 = vector.shape_cast %42 : vector<2x8x32xf32> to vector<2x1x8x32xf32>
    %59 = vector.broadcast %57 : vector<2x4x1x32xf32> to vector<2x4x8x32xf32>
    %60 = vector.broadcast %58 : vector<2x1x8x32xf32> to vector<2x4x8x32xf32>
    %61 = arith.addf %59, %60 : vector<2x4x8x32xf32>
    %62 = vector.shape_cast %61 : vector<2x4x8x32xf32> to vector<2x32x32xf32>
    %63 = arith.truncf %56 : vector<2x32x32xf32> to vector<2x32x32xbf16>
    %64 = arith.truncf %43 : vector<2x8x32xf32> to vector<2x8x32xbf16>
    "tpu.trace_start"() <{level = 10 : i32, message = "brd,bjd->brj"}> : () -> ()
    %cst_31 = arith.constant dense<0.000000e+00> : vector<2x32x8xf32>
    %65 = tpu.matmul %63, %64, %cst_31 {dimension_numbers = #tpu.dot_dimension_numbers<[2], [2], [1], [1], [0, 0, 0, 1, 1, 1], [0], [0]>} : vector<2x32x32xbf16>, vector<2x8x32xbf16>, vector<2x32x8xf32> -> vector<2x32x8xf32>
    "tpu.trace_stop"() : () -> ()
    %66 = tpu.concatenate %49, %49, %49, %49 in 1 : vector<2x8x8xf32>, vector<2x8x8xf32>, vector<2x8x8xf32>, vector<2x8x8xf32> -> vector<2x32x8xf32>
    %cst_32 = arith.constant 0.000000e+00 : f32
    %67 = vector.broadcast %cst_32 : f32 to vector<2x32x8xf32>
    %68 = arith.maximumf %65, %67 : vector<2x32x8xf32>
    %69 = arith.mulf %68, %66 : vector<2x32x8xf32>
    %cst_33 = arith.constant 0.000000e+00 : f32
    %70 = vector.broadcast %cst_33 : f32 to vector<2x32x8xf32>
    %71 = arith.subf %70, %65 : vector<2x32x8xf32>
    %cst_34 = arith.constant 0.000000e+00 : f32
    %72 = vector.broadcast %cst_34 : f32 to vector<2x32x8xf32>
    %73 = arith.maximumf %71, %72 : vector<2x32x8xf32>
    %74 = arith.mulf %73, %66 : vector<2x32x8xf32>
    %cst_35 = arith.constant dense<0.000000e+00> : vector<2x32xf32>
    %75 = vector.multi_reduction <add>, %69, %cst_35 [2] : vector<2x32x8xf32> to vector<2x32xf32>
    %76 = vector.shape_cast %75 : vector<2x32xf32> to vector<2x32x1xf32>
    %cst_36 = arith.constant 9.99999971E-10 : f32
    %77 = vector.broadcast %cst_36 : f32 to vector<2x32x1xf32>
    %78 = arith.addf %76, %77 : vector<2x32x1xf32>
    %79 = tpu.reciprocal %78 {approx = true} : vector<2x32x1xf32> -> vector<2x32x1xf32>
    %80 = vector.broadcast %79 : vector<2x32x1xf32> to vector<2x32x8xf32>
    %81 = arith.mulf %69, %80 : vector<2x32x8xf32>
    %cst_37 = arith.constant dense<0.000000e+00> : vector<2x32xf32>
    %82 = vector.multi_reduction <add>, %74, %cst_37 [2] : vector<2x32x8xf32> to vector<2x32xf32>
    %83 = vector.shape_cast %82 : vector<2x32xf32> to vector<2x32x1xf32>
    %cst_38 = arith.constant 9.99999971E-10 : f32
    %84 = vector.broadcast %cst_38 : f32 to vector<2x32x1xf32>
    %85 = arith.addf %83, %84 : vector<2x32x1xf32>
    %86 = tpu.reciprocal %85 {approx = true} : vector<2x32x1xf32> -> vector<2x32x1xf32>
    %87 = vector.broadcast %86 : vector<2x32x1xf32> to vector<2x32x8xf32>
    %88 = arith.mulf %74, %87 : vector<2x32x8xf32>
    %89 = arith.truncf %81 : vector<2x32x8xf32> to vector<2x32x8xbf16>
    %90 = arith.truncf %44 : vector<2x8x32xf32> to vector<2x8x32xbf16>
    "tpu.trace_start"() <{level = 10 : i32, message = "brj,bjd->brd"}> : () -> ()
    %cst_39 = arith.constant dense<0.000000e+00> : vector<2x32x32xf32>
    %91 = tpu.matmul %89, %90, %cst_39 {dimension_numbers = #tpu.dot_dimension_numbers<[2], [1], [1], [2], [0, 0, 0, 1, 1, 2], [0], [0]>} : vector<2x32x8xbf16>, vector<2x8x32xbf16>, vector<2x32x32xf32> -> vector<2x32x32xf32>
    "tpu.trace_stop"() : () -> ()
    %92 = arith.addf %91, %62 : vector<2x32x32xf32>
    %93 = arith.truncf %88 : vector<2x32x8xf32> to vector<2x32x8xbf16>
    %94 = arith.truncf %45 : vector<2x8x32xf32> to vector<2x8x32xbf16>
    "tpu.trace_start"() <{level = 10 : i32, message = "brj,bjd->brd"}> : () -> ()
    %cst_40 = arith.constant dense<0.000000e+00> : vector<2x32x32xf32>
    %95 = tpu.matmul %93, %94, %cst_40 {dimension_numbers = #tpu.dot_dimension_numbers<[2], [1], [1], [2], [0, 0, 0, 1, 1, 2], [0], [0]>} : vector<2x32x8xbf16>, vector<2x8x32xbf16>, vector<2x32x32xf32> -> vector<2x32x32xf32>
    "tpu.trace_stop"() : () -> ()
    %96 = arith.addf %95, %62 : vector<2x32x32xf32>
    %97 = tpu.concatenate %50, %50, %50, %50 in 1 : vector<2x8x8xf32>, vector<2x8x8xf32>, vector<2x8x8xf32>, vector<2x8x8xf32> -> vector<2x32x8xf32>
    %cst_41 = arith.constant 0.000000e+00 : f32
    %98 = vector.broadcast %cst_41 : f32 to vector<2x32x8xf32>
    %99 = arith.maximumf %65, %98 : vector<2x32x8xf32>
    %100 = arith.mulf %99, %97 : vector<2x32x8xf32>
    %cst_42 = arith.constant 0.000000e+00 : f32
    %101 = vector.broadcast %cst_42 : f32 to vector<2x32x8xf32>
    %102 = arith.subf %101, %65 : vector<2x32x8xf32>
    %cst_43 = arith.constant 0.000000e+00 : f32
    %103 = vector.broadcast %cst_43 : f32 to vector<2x32x8xf32>
    %104 = arith.maximumf %102, %103 : vector<2x32x8xf32>
    %105 = arith.mulf %104, %97 : vector<2x32x8xf32>
    %cst_44 = arith.constant dense<0.000000e+00> : vector<2x8xf32>
    %106 = vector.multi_reduction <add>, %100, %cst_44 [1] : vector<2x32x8xf32> to vector<2x8xf32>
    %107 = vector.shape_cast %106 : vector<2x8xf32> to vector<2x1x8xf32>
    %cst_45 = arith.constant 9.99999971E-10 : f32
    %108 = vector.broadcast %cst_45 : f32 to vector<2x1x8xf32>
    %109 = arith.addf %107, %108 : vector<2x1x8xf32>
    %110 = tpu.reciprocal %109 {approx = true} : vector<2x1x8xf32> -> vector<2x1x8xf32>
    %111 = vector.broadcast %110 : vector<2x1x8xf32> to vector<2x32x8xf32>
    %112 = arith.mulf %100, %111 : vector<2x32x8xf32>
    %cst_46 = arith.constant dense<0.000000e+00> : vector<2x8xf32>
    %113 = vector.multi_reduction <add>, %105, %cst_46 [1] : vector<2x32x8xf32> to vector<2x8xf32>
    %114 = vector.shape_cast %113 : vector<2x8xf32> to vector<2x1x8xf32>
    %cst_47 = arith.constant 9.99999971E-10 : f32
    %115 = vector.broadcast %cst_47 : f32 to vector<2x1x8xf32>
    %116 = arith.addf %114, %115 : vector<2x1x8xf32>
    %117 = tpu.reciprocal %116 {approx = true} : vector<2x1x8xf32> -> vector<2x1x8xf32>
    %118 = vector.broadcast %117 : vector<2x1x8xf32> to vector<2x32x8xf32>
    %119 = arith.mulf %105, %118 : vector<2x32x8xf32>
    %120 = arith.truncf %112 : vector<2x32x8xf32> to vector<2x32x8xbf16>
    %121 = arith.addf %92, %62 : vector<2x32x32xf32>
    %122 = arith.truncf %121 : vector<2x32x32xf32> to vector<2x32x32xbf16>
    "tpu.trace_start"() <{level = 10 : i32, message = "bri,brd->bid"}> : () -> ()
    %cst_48 = arith.constant dense<0.000000e+00> : vector<2x8x32xf32>
    %123 = tpu.matmul %120, %122, %cst_48 {dimension_numbers = #tpu.dot_dimension_numbers<[1], [1], [2], [2], [0, 0, 0, 2, 1, 2], [0], [0]>} : vector<2x32x8xbf16>, vector<2x32x32xbf16>, vector<2x8x32xf32> -> vector<2x8x32xf32>
    "tpu.trace_stop"() : () -> ()
    %124 = arith.truncf %119 : vector<2x32x8xf32> to vector<2x32x8xbf16>
    %125 = arith.addf %96, %62 : vector<2x32x32xf32>
    %126 = arith.truncf %125 : vector<2x32x32xf32> to vector<2x32x32xbf16>
    "tpu.trace_start"() <{level = 10 : i32, message = "bri,brd->bid"}> : () -> ()
    %cst_49 = arith.constant dense<0.000000e+00> : vector<2x8x32xf32>
    %127 = tpu.matmul %124, %126, %cst_49 {dimension_numbers = #tpu.dot_dimension_numbers<[1], [1], [2], [2], [0, 0, 0, 2, 1, 2], [0], [0]>} : vector<2x32x8xbf16>, vector<2x32x32xbf16>, vector<2x8x32xf32> -> vector<2x8x32xf32>
    "tpu.trace_stop"() : () -> ()
    %128 = arith.mulf %46, %123 : vector<2x8x32xf32>
    %cst_50 = arith.constant 1.000000e+00 : f32
    %129 = vector.broadcast %cst_50 : f32 to vector<2x8x32xf32>
    %130 = arith.subf %129, %46 : vector<2x8x32xf32>
    %131 = arith.mulf %130, %127 : vector<2x8x32xf32>
    %132 = arith.addf %128, %131 : vector<2x8x32xf32>
    %c0_51 = arith.constant 0 : index
    %c0_52 = arith.constant 0 : index
    %c0_53 = arith.constant 0 : index
    %133 = vector.load %arg12[%c0_51, %c0_52, %c0_53] : memref<2x8x32xf32, #tpu.memory_space<vmem>>, vector<2x8x32xf32>
    tpu.vector_store %arg12[%c0_51, %c0_52, %c0_53], %132 {strides = array<i32>} : memref<2x8x32xf32, #tpu.memory_space<vmem>>, vector<2x8x32xf32>,
    return
  }
  func.func @transform_0(%arg0: i32) -> (i32, i32, i32) {
    %c0_i32 = arith.constant 0 : i32
    %c0_i32_0 = arith.constant 0 : i32
    %c0_i32_1 = arith.constant 0 : i32
    return %arg0, %c0_i32, %c0_i32_0 : i32, i32, i32
  }
  func.func @transform_1(%arg0: i32) -> (i32, i32, i32) {
    %c0_i32 = arith.constant 0 : i32
    %c0_i32_0 = arith.constant 0 : i32
    %c0_i32_1 = arith.constant 0 : i32
    return %arg0, %c0_i32, %c0_i32_0 : i32, i32, i32
  }
  func.func @transform_2(%arg0: i32) -> (i32, i32, i32) {
    %c0_i32 = arith.constant 0 : i32
    %c0_i32_0 = arith.constant 0 : i32
    %c0_i32_1 = arith.constant 0 : i32
    return %arg0, %c0_i32, %c0_i32_0 : i32, i32, i32
  }
  func.func @transform_3(%arg0: i32) -> (i32, i32, i32) {
    %c0_i32 = arith.constant 0 : i32
    %c0_i32_0 = arith.constant 0 : i32
    %c0_i32_1 = arith.constant 0 : i32
    return %arg0, %c0_i32, %c0_i32_0 : i32, i32, i32
  }
  func.func @transform_4(%arg0: i32) -> (i32, i32, i32) {
    %c0_i32 = arith.constant 0 : i32
    %c0_i32_0 = arith.constant 0 : i32
    %c0_i32_1 = arith.constant 0 : i32
    return %arg0, %c0_i32, %c0_i32_0 : i32, i32, i32
  }
  func.func @transform_5(%arg0: i32) -> (i32, i32) {
    %c0_i32 = arith.constant 0 : i32
    %c0_i32_0 = arith.constant 0 : i32
    %c0_i32_1 = arith.constant 0 : i32
    return %c0_i32, %c0_i32_0 : i32, i32
  }
  func.func @transform_6(%arg0: i32) -> (i32, i32) {
    %c0_i32 = arith.constant 0 : i32
    %c0_i32_0 = arith.constant 0 : i32
    %c0_i32_1 = arith.constant 0 : i32
    return %c0_i32, %c0_i32_0 : i32, i32
  }
  func.func @transform_7(%arg0: i32) -> (i32, i32) {
    %c0_i32 = arith.constant 0 : i32
    %c0_i32_0 = arith.constant 0 : i32
    %c0_i32_1 = arith.constant 0 : i32
    return %c0_i32, %c0_i32_0 : i32, i32
  }
  func.func @transform_8(%arg0: i32) -> (i32, i32) {
    %c0_i32 = arith.constant 0 : i32
    %c0_i32_0 = arith.constant 0 : i32
    %c0_i32_1 = arith.constant 0 : i32
    return %c0_i32, %c0_i32_0 : i32, i32
  }
  func.func @transform_9(%arg0: i32) -> (i32, i32) {
    %c0_i32 = arith.constant 0 : i32
    %c0_i32_0 = arith.constant 0 : i32
    %c0_i32_1 = arith.constant 0 : i32
    return %c0_i32, %c0_i32_0 : i32, i32
  }
  func.func @transform_10(%arg0: i32) -> (i32, i32) {
    %c0_i32 = arith.constant 0 : i32
    %c0_i32_0 = arith.constant 0 : i32
    %c0_i32_1 = arith.constant 0 : i32
    return %c0_i32, %c0_i32_0 : i32, i32
  }
  func.func @transform_11(%arg0: i32) -> (i32, i32, i32) {
    %c0_i32 = arith.constant 0 : i32
    %c0_i32_0 = arith.constant 0 : i32
    %c0_i32_1 = arith.constant 0 : i32
    return %arg0, %c0_i32, %c0_i32_0 : i32, i32, i32
  }
}

</mosaic_0001>

<bundles_post_ra>
// kernel: tpu_custom_call.1
= control target key start
LH: loop header
LB: loop body
LE: loop exit
PB: predicated region body
PF: predicated region fallthrough
CT: control target
= control target key end

     0   :  { %s3861_s0 = inlined_call_operand.hbm [shape: f32[4,8,32], index: 0, kind: input, shape index: {}]   ;;  %s3862_s1 = inlined_call_operand.hbm [shape: f32[4,4,32], index: 1, kind: input, shape index: {}]   ;;  %s3863_s2 = inlined_call_operand.hbm [shape: f32[4,4,32], index: 2, kind: input, shape index: {}]   ;;  %s3864_s3 = inlined_call_operand.hbm [shape: f32[4,8,8], index: 3, kind: input, shape index: {}]   ;;  %s3865_s4 = inlined_call_operand.hbm [shape: f32[4,8,8], index: 4, kind: input, shape index: {}]   ;;  %s3866_s5 = inlined_call_operand.hbm [shape: bf16[32,160], index: 5, kind: input, shape index: {}]   ;;  %s3867_s6 = inlined_call_operand.vmem [shape: f32[1,160], index: 6, kind: input, shape index: {}]   ;;  %s3868_s7 = inlined_call_operand.vmem [shape: bf16[32,32], index: 7, kind: input, shape index: {}]   ;;  %s3869_s8 = inlined_call_operand.hbm [shape: f32[1,32], index: 8, kind: input, shape index: {}]   ;;  %s3870_s9 = inlined_call_operand.vmem [shape: bf16[32,32], index: 9, kind: input, shape index: {}]   ;;  %s3871_s10 = inlined_call_operand.vmem [shape: f32[1,32], index: 10, kind: input, shape index: {}]   ;;  %s3872_s11 = inlined_call_operand.hbm [shape: f32[4,8,32], index: 11, kind: output, shape index: {}]  }
   0x1   :  { %3907 = sst [smem:[#allocation27_spill]] %s3862_s1 }
   0x2   :  { %3908 = sst [smem:[#allocation28_spill]] %s3864_s3 }
   0x3   :  { %3909 = sst [smem:[#allocation29_spill]] %s3866_s5 }
   0x4   :  { %3910 = sst [smem:[#allocation30_spill]] %s3867_s6 }
   0x5   :  { %3911 = sst [smem:[#allocation31_spill]] %s3868_s7 }
   0x6   :  { %3912 = sst [smem:[#allocation32_spill]] %s3869_s8 }
   0x7   :  { %3913 = sst [smem:[#allocation33_spill]] %s3870_s9 }
   0x8   :  { %3914 = sst [smem:[#allocation34_spill]] %s3871_s10 }
   0x9   :  { %3915 = sst [smem:[#allocation35_spill]] %s3872_s11 }
   0xa   :  { %16 = vsyncpa [#allocation3], 0 }
   0xb   :  { %18 = vsyncpa [#allocation3 + $0x1], 0 }
   0xc   :  { %19 = vsyncpa [#allocation6], 0 }
   0xd   :  { %21 = vsyncpa [#allocation6 + $0x1], 0 }
   0xe   :  { %22 = vsyncpa [#allocation9], 0 }
   0xf   :  { %24 = vsyncpa [#allocation9 + $0x1], 0 }
  0x10   :  { %25 = vsyncpa [#allocation12], 0 }
  0x11   :  { %26 = vsyncpa [#allocation4], 0 }
  0x12   :  { %28 = vsyncpa [#allocation4 + $0x1], 0  ;;  %s2910_s17 = smov 0   ;;  %s2912_s18 = smov 0  }
  0x13   :  { %s2914_s19 = smov 0   ;;  %s2916_s20 = smov 0  }
  0x14 LB: > { %3916 = sst [smem:[#allocation20_spill]] %s2815_s17  ;;  %s2931_s21 = sadd.s32 4294967295, %s2827_s20   ;;  %s2827_s20 = sphi %s2916_s20, %s3969_s20   ;;  %s2823_s19 = sphi %s2914_s19, %s3974_s19   ;;  %s2819_s18 = sphi %s2912_s18, %s3973_s18   ;;  %s2815_s17 = sphi %s2910_s17, %s3972_s17  }
  0x15   : > { %3917 = sst [smem:[#allocation21_spill]] %s2823_s19  ;;  %s2163_s22 = sadd.s32 4294967294, %s2827_s20  }
  0x16   : > { %3918 = sst [smem:[#allocation22_spill]] %s2931_s21  ;;  %s2935_s23 = sadd.s32 1, %s2827_s20  }
  0x17   : > { %3919 = sst [smem:[#allocation23_spill]] %s2935_s23  ;;  %s41_s24 = sadd.s32 1, %s2823_s19 }
  0x18   : > { %s38_s25 = ssub.s32 %s2827_s20, %s2935_s23  ;;  %p48_p0 = scmp.ne.s32.totalorder %s2823_s19, %s2819_s18 }
  0x19   : > { %p39_p1 = scmp.eq.s32.totalorder %s38_s25, 0  ;;  %p49_p2 = scmp.eq.s32.totalorder %s2827_s20, 0 }
  0x1a   : > { %p54_p3 = scmp.ne.s32.totalorder %s2819_s18, %s2815_s17  ;;  %p3877_p4 = scmp.eq.s32.totalorder %s2931_s21, 0 }
  0x1b   : > { %s2947_s26 = scalar_select %p39_p1, %s2823_s19, %s41_s24  }
  0x1c   : > { %p2949_p5 = por %p49_p2, %p48_p0  ;;  %p2955_p6 = por %p3877_p4, %p54_p3 }
  0x1d   : > { %3920 = sst [smem:[#allocation24_spill]] %s2947_s26  ;;  %p308_p7 = scmp.eq.s32.totalorder %s2931_s21, 1 }
  0x1e   : > { %s3921_s27 = scalar_select %p2949_p5, 1, 0 }
  0x1f   : > { %s3922_s28 = scalar_select %p2955_p6, 1, 0 }
  0x20   : > { %p314_p8 = scmp.eq.s32.totalorder %s2163_s22, 1  ;;  %p2164_p9 = scmp.ge.s32.totalorder %s2827_s20, 1 }
  0x21   : > { %p321_p10 = scmp.lt.s32.totalorder %s2827_s20, 3  ;;  %p2962_p11 = por %p308_p7, %p48_p0 }
  0x22   : > { %p2966_p12 = por %p314_p8, %p54_p3  ;;  %s2829_s13 = smov [#allocation11]  }
  0x23   : > { %s3923_s29 = scalar_select %p2962_p11, 1, 0 }
  0x24   : > { %s3925_s30 = scalar_select %p2966_p12, 1, 0 }
  0x25   : > { %3924 = sst [smem:[#allocation25_spill]] %s3923_s29  ;;  %p2970_p13 = pnand %p2164_p9, %p321_p10 }
  0x26   : > { %3926 = sst [smem:[#allocation26_spill]] %s3925_s30  ;;  %s333_s14 = sshll.u32 %s2829_s13, 4  ;;  %s334_s14 = int_to_ptr.vmem [resolvable:$true] %s333_s14 }
  0x27   : > { %s3927_s12 = scalar_select %p2970_p13, 1, 0 }
  0x28   : > { %p2388_p1 = pneg %p2970_p13  ;;  %s2985_s16 = sand.u32 1, %s2823_s19  }
  0x29   : > { %s3929_s5 = sld [smem:[#allocation29_spill]] }
  0x2a   : > { %p2978_p2 = pnand %p2388_p1, %p3877_p4 }
  0x2c   : > { %s3928_s15 = scalar_select %p2978_p2, 1, 0 }
  0x2d   : > { %p3889_p8 = pneg %p2978_p2 }
  0x2f   : > { %s2543_s26 = scalar_lea.hbm %s3929_s5, 512 }
  0x30   : > { %p2544_p7 = scmp.ne.s32.totalorder %s3929_s5, %s2543_s26  ;;  %p2550_p1 = scmp.lt.u32.totalorder %s2543_s26, %s3929_s5 }
  0x32   : > { %p2546_p9 = pnand %p3889_p8, %p2544_p7 }
  0x34   : > { %p2547_p10 = pneg %p2546_p9 }
  0x36   : > { %p2552_p0 = pnand %p2550_p1, %p2547_p10 }
  0x38   : > { %2555 = shalt.err (!%p2552_p0)
}
  0x39   : > { %s2556_s22 = scalar_lea.vmem %s334_s14, 512  ;;  %p2564_p11 = scmp.lt.s32.totalorder %s334_s14, %s334_s14 }
  0x3a   : > { %p2557_p4 = scmp.ne.s32.totalorder %s334_s14, %s2556_s22  ;;  %p2565_p6 = scmp.lt.s32.totalorder %s2556_s22, %s2556_s22 }
  0x3c   : > { %p2559_p3 = pnand %p2557_p4, %p3889_p8  ;;  %p2566_p13 = por %p2565_p6, %p2564_p11 }
  0x3e   : > { %p2560_p12 = pneg %p2559_p3 }
  0x40   : > { %p2567_p5 = pnand %p2566_p13, %p2560_p12 }
  0x42   : > { %2570 = shalt.err (!%p2567_p5)
}
  0x43   : > { %s3883_s23 = smov 128   ;;  %s3885_s17 = smov 8  }
  0x44   : > { %2391 = dma.hbm_to_vmem [thread:$0]  (!%p2978_p2), %s3929_s5, 512, %s334_s14, [#allocation12], %s3883_s23, %s3883_s23, %s3885_s17  }
  0x45   : > { %p3930_p4 = scmp.ne.s32.totalorder %s3921_s27, 0  ;;  %p3931_p5 = scmp.lt.s32.totalorder %s2827_s20, 2 }
  0x46   : > { %s3887_s24 = sshll.u32 %s2985_s16, 3  ;;  %s3888_s25 = sshll.u32 %s2827_s20, 7 }
  0x47   : > { %p3017_p6 = pnand %p3931_p5, %p3930_p4  ;;  %s3933_s1 = sld [smem:[#allocation27_spill]] }
  0x48   : > { %s395_s27 = scalar_lea.vmem [#allocation5], %s3887_s24  ;;  %s3934_s26 = sand.u32 1, %s2827_s20  }
  0x49   : > { %s3932_s22 = scalar_select %p3017_p6, 1, 0 }
  0x4a   : > { %s402_s14 = sshll.u32 %s395_s27, 4  ;;  %s3036_s30 = scalar_lea.sflag [#allocation6], %s3934_s26  ;;  %s3032_s14 = int_to_ptr.vmem [resolvable:$true] %s402_s14 }
  0x4b   : > { %p3042_p12 = pneg %p3017_p6 }
  0x4d   : > { %s3028_s11 = scalar_lea.hbm %s3933_s1, %s3888_s25  ;;  %s2576_s27 = scalar_lea.hbm %s3933_s1, 256 }
  0x4e   : > { %s2571_s23 = scalar_lea.hbm %s3028_s11, 128  ;;  %p2577_p3 = scmp.lt.u32.totalorder %s3028_s11, %s3933_s1 }
  0x4f   : > { %p2572_p11 = scmp.ne.s32.totalorder %s3028_s11, %s2571_s23  ;;  %p2578_p7 = scmp.lt.u32.totalorder %s2576_s27, %s2571_s23 }
  0x50   : > { %s3935_s17 = scalar_select %p3042_p12, 1, 0 }
  0x51   : > { %p2574_p13 = pnand %p3042_p12, %p2572_p11  ;;  %p2579_p9 = por %p2578_p7, %p2577_p3 }
  0x52   : > { %p2580_p10 = scmp.lt.u32.totalorder %s2571_s23, %s3028_s11 }
  0x53   : > { %p2575_p0 = pneg %p2574_p13 }
  0x54   : > { %p2581_p1 = por %p2580_p10, %p2579_p9 }
  0x56   : > { %p2582_p4 = pnand %p2581_p1, %p2575_p0 }
  0x58   : > { %2585 = shalt.err (!%p2582_p4)
}
  0x59   : > { %s2586_s26 = scalar_lea.vmem %s3032_s14, 128  ;;  %s2832_s19 = smov [#allocation5]  }
  0x5a   : > { %p2587_p5 = scmp.ne.s32.totalorder %s3032_s14, %s2586_s26  ;;  %s2591_s13 = sshll.u32 %s2832_s19, 4  ;;  %s2592_s13 = int_to_ptr.vmem [resolvable:$false] %s2591_s13 }
  0x5b   : > { %s2593_s24 = scalar_lea.vmem %s2592_s13, 256  ;;  %p2594_p8 = scmp.lt.s32.totalorder %s3032_s14, %s2592_s13 }
  0x5c   : > { %p2589_p11 = pnand %p2587_p5, %p3042_p12  ;;  %p2595_p2 = scmp.lt.s32.totalorder %s2593_s24, %s2586_s26 }
  0x5e   : > { %p2590_p13 = pneg %p2589_p11  ;;  %p2596_p3 = por %p2595_p2, %p2594_p8 }
  0x60   : > { %p2597_p7 = pnand %p2596_p3, %p2590_p13 }
  0x62   : > { %2600 = shalt.err (!%p2597_p7)
}
  0x63   : > { %s3895_s23 = smov 64   ;;  %s3896_s25 = smov 4  }
  0x64   : > { %2401 = dma.hbm_to_vmem [thread:$0]  (!%p3017_p6), %s3028_s11, 128, %s3032_s14, %s3036_s30, %s3895_s23, %s3895_s23, %s3896_s25  }
  0x65   : > { %s3936_s27 = sshll.u32 %s2827_s20, 7  ;;  %s3937_s24 = sshll.u32 %s2985_s16, 3 }
  0x66   : > { %s3074_s13 = scalar_lea.hbm %s3863_s2, %s3936_s27  ;;  %s416_s1 = scalar_lea.vmem [#allocation7], %s3937_s24 }
  0x67   : > { %s423_s5 = sshll.u32 %s416_s1, 4  ;;  %s3081_s29 = sshll.u32 %s2985_s16, 4  ;;  %s3078_s5 = int_to_ptr.vmem [resolvable:$true] %s423_s5 }
  0x68   : > { %s3084_s10 = sshll.u32 %s2827_s20, 8  ;;  %s3938_s3 = sld [smem:[#allocation28_spill]] }
  0x69   : > { %s437_s27 = scalar_lea.vmem [#allocation8], %s3081_s29  ;;  %s2835_s1 = smov [#allocation13]  }
  0x6a   : > { %s444_s26 = sshll.u32 %s437_s27, 4  ;;  %s3095_s19 = sshll.u32 %s2835_s1, 4  ;;  %s3093_s26 = int_to_ptr.vmem [resolvable:$true] %s444_s26  ;;  %s354_s19 = int_to_ptr.vmem [resolvable:$true] %s3095_s19 }
  0x6b   : > { %s3939_s24 = sand.u32 1, %s2827_s20  }
  0x6c   : > { %s3099_s23 = scalar_lea.sflag [#allocation9], %s3939_s24 }
  0x6e   : > { %s3090_s14 = scalar_lea.hbm %s3938_s3, %s3084_s10  ;;  %s2606_s9 = scalar_lea.hbm %s3938_s3, 512 }
  0x6f   : > { %s2601_s25 = scalar_lea.hbm %s3090_s14, 256  ;;  %p2607_p9 = scmp.lt.u32.totalorder %s3090_s14, %s3938_s3 }
  0x70   : > { %p2602_p2 = scmp.ne.s32.totalorder %s3090_s14, %s2601_s25  ;;  %p2608_p10 = scmp.lt.u32.totalorder %s2606_s9, %s2601_s25 }
  0x71   : > { %p2610_p4 = scmp.lt.u32.totalorder %s2601_s25, %s3090_s14 }
  0x72   : > { %p2604_p8 = pnand %p2602_p2, %p3042_p12  ;;  %p2609_p1 = por %p2608_p10, %p2607_p9 }
  0x74   : > { %p2605_p0 = pneg %p2604_p8  ;;  %p2611_p5 = por %p2610_p4, %p2609_p1 }
  0x76   : > { %p2612_p11 = pnand %p2611_p5, %p2605_p0 }
  0x78   : > { %2615 = shalt.err (!%p2612_p11)
}
  0x79   : > { %s2616_s27 = scalar_lea.vmem %s3093_s26, 256  ;;  %s2836_s1 = smov [#allocation8]  }
  0x7a   : > { %p2617_p13 = scmp.ne.s32.totalorder %s3093_s26, %s2616_s27  ;;  %s2621_s24 = sshll.u32 %s2836_s1, 4  ;;  %s2622_s24 = int_to_ptr.vmem [resolvable:$false] %s2621_s24 }
  0x7b   : > { %s2623_s7 = scalar_lea.vmem %s2622_s24, 512  ;;  %p2624_p2 = scmp.lt.s32.totalorder %s3093_s26, %s2622_s24 }
  0x7c   : > { %p2619_p3 = pnand %p2617_p13, %p3042_p12  ;;  %p2625_p8 = scmp.lt.s32.totalorder %s2623_s7, %s2616_s27 }
  0x7e   : > { %p2620_p7 = pneg %p2619_p3  ;;  %p2626_p9 = por %p2625_p8, %p2624_p2 }
  0x80   : > { %p2627_p10 = pnand %p2626_p9, %p2620_p7 }
  0x82   : > { %2630 = shalt.err (!%p2627_p10)
}
  0x83   : > { %s3940_s9 = smov 8   ;;  %s3941_s21 = smov 128  }
  0x84   : > { %2407 = dma.hbm_to_vmem [thread:$0]  (!%p3017_p6), %s3090_s14, 256, %s3093_s26, %s3099_s23, %s3941_s21, %s3941_s21, %s3940_s9  }
  0x85   : > { %s3942_s8 = sld [smem:[#allocation32_spill]]  ;;  %p3943_p1 = scmp.ne.s32.totalorder %s3928_s15, 0 }
  0x87   : > { %p3944_p4 = pneg %p3943_p1 }
  0x8b   : > { %s2631_s11 = scalar_lea.hbm %s3942_s8, 16 }
  0x8c   : > { %p2632_p0 = scmp.ne.s32.totalorder %s3942_s8, %s2631_s11  ;;  %p2638_p13 = scmp.lt.u32.totalorder %s2631_s11, %s3942_s8 }
  0x8e   : > { %p2634_p5 = pnand %p2632_p0, %p3944_p4 }
  0x90   : > { %p2635_p11 = pneg %p2634_p5 }
  0x92   : > { %p2640_p3 = pnand %p2638_p13, %p2635_p11 }
  0x94   : > { %2643 = shalt.err (!%p2640_p3)
}
  0x95   : > { %s2644_s14 = scalar_lea.vmem %s354_s19, 16  ;;  %p3945_p2 = pmov %p3944_p4 }
  0x96   : > { %p2645_p7 = scmp.ne.s32.totalorder %s354_s19, %s2644_s14  ;;  %s2651_s26 = scalar_lea.vmem %s354_s19, 32 }
  0x97   : > { %p2652_p10 = scmp.lt.s32.totalorder %s354_s19, %s354_s19  ;;  %p2653_p6 = scmp.lt.s32.totalorder %s2651_s26, %s2644_s14 }
  0x98   : > { %p2647_p8 = pnand %p2645_p7, %p3945_p2 }
  0x99   : > { %p2654_p12 = por %p2653_p6, %p2652_p10 }
  0x9a   : > { %p2648_p9 = pneg %p2647_p8 }
  0x9c   : > { %p2655_p0 = pnand %p2654_p12, %p2648_p9 }
  0x9e   : > { %2658 = shalt.err (!%p2655_p0)
}
  0x9f   : > { %2394 = dma.hbm_to_vmem [thread:$0]  (!%p3943_p1), %s3942_s8, 16, %s354_s19, [#allocation12]  }
  0xa0   : > { %s3151_s1 = scalar_lea.hbm %s3861_s0, %s3084_s10  ;;  %s374_s24 = scalar_lea.vmem [#allocation2], %s3081_s29 }
  0xa1   : > { %s381_s15 = sshll.u32 %s374_s24, 4  ;;  %s3160_s26 = scalar_lea.hbm %s3865_s4, %s3084_s10  ;;  %s3154_s15 = int_to_ptr.vmem [resolvable:$true] %s381_s15 }
  0xa2   : > { %s371_s25 = scalar_lea.sflag [#allocation3], %s2985_s16  ;;  %s2659_s19 = scalar_lea.hbm %s3151_s1, 256 }
  0xa3   : > { %p2660_p6 = scmp.ne.s32.totalorder %s3151_s1, %s2659_s19  ;;  %p3946_p12 = scmp.ne.s32.totalorder %s3935_s17, 0 }
  0xa4   : > { %s2664_s27 = scalar_lea.hbm %s3861_s0, 512  ;;  %p2665_p5 = scmp.lt.u32.totalorder %s3151_s1, %s3861_s0 }
  0xa5   : > { %p2662_p1 = pnand %p2660_p6, %p3946_p12  ;;  %p2666_p11 = scmp.lt.u32.totalorder %s2664_s27, %s2659_s19 }
  0xa6   : > { %p2668_p3 = scmp.lt.u32.totalorder %s2659_s19, %s3151_s1 }
  0xa7   : > { %p2663_p4 = pneg %p2662_p1  ;;  %p2667_p13 = por %p2666_p11, %p2665_p5 }
  0xa9   : > { %p2669_p7 = por %p2668_p3, %p2667_p13 }
  0xab   : > { %p2670_p2 = pnand %p2669_p7, %p2663_p4 }
  0xad   : > { %2673 = shalt.err (!%p2670_p2)
}
  0xae   : > { %s2674_s10 = scalar_lea.vmem %s3154_s15, 256  ;;  %s2837_s24 = smov [#allocation2]  }
  0xaf   : > { %p2675_p8 = scmp.ne.s32.totalorder %s3154_s15, %s2674_s10  ;;  %s2679_s7 = sshll.u32 %s2837_s24, 4  ;;  %s2680_s7 = int_to_ptr.vmem [resolvable:$false] %s2679_s7 }
  0xb0   : > { %s2681_s3 = scalar_lea.vmem %s2680_s7, 512  ;;  %p2682_p0 = scmp.lt.s32.totalorder %s3154_s15, %s2680_s7 }
  0xb1   : > { %p2677_p9 = pnand %p2675_p8, %p3946_p12  ;;  %p2683_p6 = scmp.lt.s32.totalorder %s2681_s3, %s2674_s10 }
  0xb3   : > { %p2678_p10 = pneg %p2677_p9  ;;  %p2684_p1 = por %p2683_p6, %p2682_p0 }
  0xb5   : > { %p2685_p5 = pnand %p2684_p1, %p2678_p10 }
  0xb7   : > { %2688 = shalt.err (!%p2685_p5)
}
  0xb8   : > { %p3947_p4 = scmp.ne.s32.totalorder %s3932_s22, 0  ;;  %s2689_s8 = scalar_lea.hbm %s3074_s13, 128 }
  0xb9   : > { %p2690_p11 = scmp.ne.s32.totalorder %s3074_s13, %s2689_s8  ;;  %s2694_s6 = scalar_lea.hbm %s3863_s2, 256 }
  0xba   : > { %2398 = dma.hbm_to_vmem [thread:$0]  (!%p3947_p4), %s3151_s1, 256, %s3154_s15, %s371_s25, %s3941_s21, %s3941_s21, %s3940_s9  }
  0xbb   : > { %p2692_p13 = pnand %p2690_p11, %p3946_p12  ;;  %p2695_p7 = scmp.lt.u32.totalorder %s3074_s13, %s3863_s2 }
  0xbc   : > { %p2696_p2 = scmp.lt.u32.totalorder %s2694_s6, %s2689_s8  ;;  %p2698_p9 = scmp.lt.u32.totalorder %s2689_s8, %s3074_s13 }
  0xbd   : > { %p2693_p3 = pneg %p2692_p13 }
  0xbe   : > { %p2697_p8 = por %p2696_p2, %p2695_p7 }
  0xc0   : > { %p2699_p10 = por %p2698_p9, %p2697_p8 }
  0xc2   : > { %p2700_p0 = pnand %p2699_p10, %p2693_p3 }
  0xc4   : > { %2703 = shalt.err (!%p2700_p0)
}
  0xc5   : > { %s2704_s16 = scalar_lea.vmem %s3078_s5, 128  ;;  %s2838_s1 = smov [#allocation7]  }
  0xc6   : > { %p2705_p6 = scmp.ne.s32.totalorder %s3078_s5, %s2704_s16  ;;  %s2709_s15 = sshll.u32 %s2838_s1, 4  ;;  %s2710_s15 = int_to_ptr.vmem [resolvable:$false] %s2709_s15 }
  0xc7   : > { %s2711_s25 = scalar_lea.vmem %s2710_s15, 256  ;;  %p2712_p11 = scmp.lt.s32.totalorder %s3078_s5, %s2710_s15 }
  0xc8   : > { %p2707_p1 = pnand %p2705_p6, %p3946_p12  ;;  %p2713_p13 = scmp.lt.s32.totalorder %s2711_s25, %s2704_s16 }
  0xca   : > { %p2708_p5 = pneg %p2707_p1  ;;  %p2714_p7 = por %p2713_p13, %p2712_p11 }
  0xcc   : > { %p2715_p2 = pnand %p2714_p7, %p2708_p5 }
  0xce   : > { %2718 = shalt.err (!%p2715_p2)
}
  0xcf   : > { %s3948_s10 = smov 4   ;;  %s3949_s24 = smov 64  }
  0xd0   : > { %2404 = dma.hbm_to_vmem [thread:$0]  (!%p3947_p4), %s3074_s13, 128, %s3078_s5, %s3036_s30, %s3949_s24, %s3949_s24, %s3948_s10  }
  0xd1   : > { %s458_s7 = scalar_lea.vmem [#allocation10], %s3081_s29  ;;  %s2719_s8 = scalar_lea.hbm %s3160_s26, 256 }
  0xd2   : > { %s465_s3 = sshll.u32 %s458_s7, 4  ;;  %p2720_p3 = scmp.ne.s32.totalorder %s3160_s26, %s2719_s8  ;;  %s3215_s3 = int_to_ptr.vmem [resolvable:$true] %s465_s3 }
  0xd3   : > { %s2724_s6 = scalar_lea.hbm %s3865_s4, 512  ;;  %p2725_p10 = scmp.lt.u32.totalorder %s3160_s26, %s3865_s4 }
  0xd4   : > { %p2722_p8 = pnand %p2720_p3, %p3946_p12  ;;  %p2726_p0 = scmp.lt.u32.totalorder %s2724_s6, %s2719_s8 }
  0xd5   : > { %p2728_p1 = scmp.lt.u32.totalorder %s2719_s8, %s3160_s26 }
  0xd6   : > { %p2723_p9 = pneg %p2722_p8  ;;  %p2727_p6 = por %p2726_p0, %p2725_p10 }
  0xd8   : > { %p2729_p5 = por %p2728_p1, %p2727_p6 }
  0xda   : > { %p2730_p11 = pnand %p2729_p5, %p2723_p9 }
  0xdc   : > { %2733 = shalt.err (!%p2730_p11)
}
  0xdd   : > { %s2734_s5 = scalar_lea.vmem %s3215_s3, 256  ;;  %s2839_s29 = smov [#allocation10]  }
  0xde   : > { %p2735_p13 = scmp.ne.s32.totalorder %s3215_s3, %s2734_s5  ;;  %s2739_s30 = sshll.u32 %s2839_s29, 4  ;;  %s2740_s30 = int_to_ptr.vmem [resolvable:$false] %s2739_s30 }
  0xdf   : > { %s2741_s13 = scalar_lea.vmem %s2740_s30, 512  ;;  %p2742_p3 = scmp.lt.s32.totalorder %s3215_s3, %s2740_s30 }
  0xe0   : > { %p2737_p7 = pnand %p2735_p13, %p3946_p12  ;;  %p2743_p8 = scmp.lt.s32.totalorder %s2741_s13, %s2734_s5 }
  0xe2   : > { %p2738_p2 = pneg %p2737_p7  ;;  %p2744_p10 = por %p2743_p8, %p2742_p3 }
  0xe4   : > { %p2745_p0 = pnand %p2744_p10, %p2738_p2 }
  0xe6   : > { %2748 = shalt.err (!%p2745_p0)
}
  0xe7   : > { %2410 = dma.hbm_to_vmem [thread:$0]  (!%p3947_p4), %s3160_s26, 256, %s3215_s3, %s3099_s23, %s3941_s21, %s3941_s21, %s3940_s9  }
  0xe8   : > { %p3950_p12 = scmp.ne.s32.totalorder %s3927_s12, 0 }
  0xe9   : > { %s3245_s17 = sand.u32 (!%p3950_p12), 1, %s2819_s18   ;;  %p3951_p9 = scmp.ne.s32.totalorder (!%p3950_p12), %s3922_s28, 0 }
  0xea   : > { %477 = sbr.rel (%p3950_p12) target bundleno = 1627 (0x65b), region = 64  ;;  %s3248_s16 = sshll.u32 (!%p3950_p12), %s3245_s17, 4 }
  0xeb   : > { %s480_s22 = scalar_lea.sflag (!%p3950_p12), [#allocation3], %s3245_s17  ;;  %s483_s1 = scalar_lea.vmem (!%p3950_p12), [#allocation2], %s3248_s16 }
  0xf1   : > { %2794 = dma.done.wait (%p3951_p9), %s480_s22, 256  }
  0xf2   : > { %2796 = vsyncadd (%p3951_p9), %s480_s22, 4294967040  ;;  %s3952_s23 = sld [smem:[#allocation22_spill]]  ;;  %s2185_s9 = sshll.u32 %s3245_s17, 3 }
  0xf3   : > { %s3258_s26 = scalar_lea.vmem [#allocation5], %s2185_s9 }
  0xf8   : > { %s488_s12 = sand.u32 1, %s3952_s23  }
  0xf9   : > { %s489_s21 = scalar_lea.sflag [#allocation6], %s488_s12 }
  0xfa   : > { %2798 = dma.done.wait (%p3951_p9), %s489_s21, 256  }
  0xfb   : > { %2800 = vsyncadd (%p3951_p9), %s489_s21, 4294967040  ;;  %s3264_s15 = scalar_lea.vmem [#allocation7], %s2185_s9  ;;  %s507_s25 = scalar_lea.sflag [#allocation9], %s488_s12 }
  0xfc   : > { %s510_s10 = scalar_lea.vmem [#allocation8], %s3248_s16 }
  0xfd   : > { %2802 = dma.done.wait (%p3951_p9), %s507_s25, 512  }
  0xfe   : > { %2804 = vsyncadd (%p3951_p9), %s507_s25, 4294966784  ;;  %s519_s24 = scalar_lea.vmem [#allocation10], %s3248_s16  ;;  %p3953_p4 = scmp.eq.s32.totalorder %s3952_s23, 0 }
 0x100   : > { %2806 = dma.done.wait (%p3953_p4), [#allocation12], 528   ;;  %p3954_p6 = pmov %p3953_p4 }
 0x101   : > { %v2840_v0 = vmov 0   ;;  %v2468_v1 = vld [vmem:[#allocation11 + $0x4] ss:$8 sps:$4 sm:$0xff]   ;;  %v2470_v2 = vld [vmem:[#allocation11] ss:$8 sps:$4 sm:$0xff]   ;;  %vm632_vm0 = vcmask 261120   ;;  %v602_v13 = vlaneseq }
 0x102   : > { %2808 = vsyncadd (%p3954_p6), [#allocation12], 4294966768  ;;  %668 = vmatprep.mubr.bf16.mxu0 %v2840_v0  ;;  %636 = vmatprep.subr.bf16.mxu0 %v2468_v1  ;;  %v2471_v3 = vld [vmem:[#allocation11 + $0x14] ss:$8 sps:$4 sm:$0xff]   ;;  %v2473_v4 = vld [vmem:[#allocation11 + $0x10] ss:$8 sps:$4 sm:$0xff]  }
 0x103   : > { %637 = vmatpush1.bf16.msra.mxu0 %v2470_v2  ;;  %v593_v5 = vld [vmem:[%s483_s1] sm:$0xff]  ;;  %v594_v6 = vld [vmem:[%s483_s1 + $0x8] sm:$0xff]  ;;  %s3955_s3 = sld [smem:[#allocation31_spill]]  ;;  %s3956_s19 = sld [smem:[#allocation33_spill]]  ;;  %v3905_v10 = vmov 0.0   ;;  %v3293_v14 = vshrl.u32 %v602_v13, 7 }
 0x104   : > { %638 = vmatprep.subr.bf16.mxu0 %v2471_v3  ;;  %v595_v7 = vpack.c.bf16 %v594_v6, %v593_v5  ;;  %2278 = vmatprep.subr.bf16.mxu1 %v3905_v10  ;;  %vm2842_vm1 = vmmov 0   ;;  %s3958_s22 = sld [smem:[#allocation30_spill]]  ;;  %s2843_s1 = smov 96   ;;  %v2846_v27 = vmov 1966171168   ;;  %vm1247_vm2 = vcmask 64512  }
 0x105   : > { %v3296_v15 = vsub.s32 0, %v3293_v14  ;;  %2282 = vmatprep.mubr.msk.bf16.mxu1 %vm2842_vm1, %v3905_v10  ;;  %s2844_s12 = smov 64   ;;  %s2845_s9 = smov 32   ;;  %v894_v28 = vunpack.c.l.s4 %v2846_v27  ;;  %vm1359_vm3 = vcmask 1043456  }
 0x106   : > { %v2211_v30 = vld.sshfl [vmem:[%s3258_s26] sm:$0x33 pattern:$0x75316420]  ;;  %s3959_s25 = sld [smem:[#allocation34_spill]]  ;;  %s3962_s28 = sld [smem:[#allocation25_spill]] }
 0x107   : > { %639 = vmatpush1.bf16.msra.mxu0 %v2473_v4  ;;  %v895_v29 = vunpack.c.0.s8 %v894_v28  ;;  %v892_v31 = vcombine.high %v2211_v30, %v2211_v30  ;;  %v2212_v33 = vld.sshfl [vmem:[%s3258_s26 + $0x4] sm:$0x33 pattern:$0x75316420]  ;;  %s2241_s7 = sshll.u32 %s3952_s23, 8  ;;  %s3963_s11 = sld [smem:[#allocation35_spill]] }
 0x108   : > { %2286 = vmatprep.subr.bf16.mxu0 %v3905_v10  ;;  %v916_v36 = vcombine.high %v2212_v33, %v2212_v33  ;;  %s2847_s5 = smov [#allocation14]  }
 0x109   : > { %v2474_v8 = vld [vmem:[%s3955_s3] sm:$0xff]   ;;  %s3957_s6 = smov %s3956_s19  ;;  %v2475_v11 = vld [vmem:[%s3955_s3 + $0x8] sm:$0xff]   ;;  %v3326_v32 = vsub.s32 %v895_v29, %v3293_v14  ;;  %s2753_s29 = sshll.u32 %s2847_s5, 4  ;;  %s2754_s29 = int_to_ptr.vmem [resolvable:$false] %s2753_s29 }
 0x10a   : > { %2196 = vmatmul.mubr.msk.bf16.vlgmr.msra.gmra.mrb[0].mxu0 %vm632_vm0, %v595_v7  ;;  %v2476_v9 = vld [vmem:[%s3956_s19] sm:$0xff]   ;;  %2279 = vmatpush3.bf16.msra.mxu1 %v2474_v8  ;;  %v2477_v12 = vld [vmem:[%s3957_s6 + $0x8] sm:$0xff]   ;;  %s2755_s30 = scalar_lea.vmem %s2754_s29, 512 }
 0x10b   : > { %2287 = vmatpush3.bf16.msra.mxu0 %v2476_v9  ;;  %2280 = vmatprep.subr.bf16.mxu1 %v3905_v10  ;;  %v600_v16 = vld [vmem:[%s3958_s22] sm:$0x3]  ;;  %v899_v34 = vrot.slane %v2211_v30, %v3326_v32  ;;  %v906_v35 = vrot.slane %v892_v31, %v3326_v32  ;;  %v923_v39 = vrot.slane %v2212_v33, %v3326_v32 }
 0x10c   : > { %2288 = vmatprep.subr.bf16.mxu0 %v3905_v10  ;;  %2290 = vmatprep.mubr.msk.bf16.mxu0 %vm2842_vm1, %v3905_v10  ;;  %v605_v17 = vrot.slane %v600_v16, %v3296_v15  ;;  %v930_v40 = vrot.slane %v916_v36, %v3326_v32  ;;  %v2199_v36 = vld [vmem:[#allocation13] ss:$0 sm:$0xff]  ;;  %p3964_p5 = scmp.ne.s32.totalorder %s3962_s28, 0 }
 0x10d   : > { %v936_v37 = vrot.slane %v899_v34, %v3296_v15  ;;  %v940_v38 = vrot.slane %v906_v35, %v3296_v15  ;;  %v907_v41 = vcombine.high %v899_v34, %v899_v34  ;;  %v908_v42 = vcombine.high %v906_v35, %v906_v35  ;;  %s3814_s27 = scalar_lea.hbm %s3963_s11, %s2241_s7 }
 0x10e   : > { %2281 = vmatpush3.bf16.msra.mxu1 %v2475_v11  ;;  %v952_v45 = vrot.slane %v923_v39, %v3296_v15  ;;  %v956_v46 = vrot.slane %v930_v40, %v3296_v15  ;;  %v931_v48 = vcombine.high %v923_v39, %v923_v39  ;;  %v932_v50 = vcombine.high %v930_v40, %v930_v40 }
 0x10f   : > { %2289 = vmatpush3.bf16.msra.mxu0 %v2477_v12  ;;  %v944_v51 = vrot.slane %v907_v41, %v3296_v15  ;;  %v948_v52 = vrot.slane %v908_v42, %v3296_v15 }
 0x110   : > { %v960_v58 = vrot.slane %v931_v48, %v3296_v15  ;;  %v964_v62 = vrot.slane %v932_v50, %v3296_v15 }
 0x1dd   : > { %v670_v18 = vpop.f32.mrb[0].mxu0 }
 0x1de   : > { %v3306_v19 = vadd.f32 %v670_v18, %v605_v17  ;;  %v3308_v20 = vpop.f32.mrb[1].mxu0 }
 0x1df   : > { %v674_v21 = vpop.f32.mrb[2].mxu0 }
 0x1e0   : > { %v3310_v22 = vadd.f32 %v674_v21, %v605_v17  ;;  %v3312_v23 = vpop.f32.mrb[3].mxu0  ;;  %v1083_v24 = vpack.c.bf16 %v3306_v19, %v3306_v19  ;;  %v973_v43 = vadd.f32 %v936_v37, %v3306_v19  ;;  %v974_v44 = vadd.f32 %v940_v38, %v3306_v19  ;;  %v881_v17 = vld [vmem:[%s519_s24] sm:$0xff] }
 0x1e1   : > { %v975_v60 = vadd.f32 %v944_v51, %v3306_v19  ;;  %v976_v61 = vadd.f32 %v948_v52, %v3306_v19 }
 0x1e2   : > { %1086 = vrot.lane.b32.xlu1 %v1083_v24, %s2843_s1  ;;  %v691_v25 = vpack.c.bf16 %v3310_v22, %v3306_v19  ;;  %v1084_v26 = vpack.c.bf16 %v3310_v22, %v3310_v22  ;;  %v1079_v54 = vpack.c.bf16 %v974_v44, %v973_v43  ;;  %v977_v55 = vadd.f32 %v952_v45, %v3310_v22 }
 0x1e3   : > { %v978_v56 = vadd.f32 %v956_v46, %v3310_v22  ;;  %v1080_v1 = vpack.c.bf16 %v976_v61, %v975_v60  ;;  %v979_v2 = vadd.f32 %v960_v58, %v3310_v22  ;;  %v980_v3 = vadd.f32 %v964_v62, %v3310_v22  ;;  %v3429_v60 = vld [vmem:[%s510_s10] sm:$0xff] }
 0x1e4   : > { %704 = vrot.lane.b32.xlu0 %v691_v25, %s2844_s12 }
 0x1e5   : > { %v1081_v0 = vpack.c.bf16 %v978_v56, %v977_v55  ;;  %v1082_v4 = vpack.c.bf16 %v980_v3, %v979_v2  ;;  %v882_v55 = vld [vmem:[%s519_s24 + $0x8] sm:$0xff]  ;;  %s585_s24 = scalar_lea.vmem [#allocation14], %s3248_s16  ;;  %s1972_s16 = scalar_lea.sflag [#allocation4], %s3245_s17 }
 0x1e6   : > { %1147 = vrot.lane.b32.xlu1 %v1084_v26, %s2843_s1  ;;  %s1985_s8 = sshll.u32 %s585_s24, 4  ;;  %s3816_s8 = int_to_ptr.vmem [resolvable:$true] %s1985_s8 }
 0x1e7   : > { %s2749_s23 = scalar_lea.vmem %s3816_s8, 256  ;;  %p2756_p7 = scmp.lt.s32.totalorder %s3816_s8, %s2754_s29 }
 0x1e8   : > { %795 = vrot.lane.b32.xlu0 %v691_v25, %s2845_s9  ;;  %p2750_p1 = scmp.ne.s32.totalorder %s3816_s8, %s2749_s23  ;;  %p2757_p2 = scmp.lt.s32.totalorder %s2755_s30, %s2749_s23 }
 0x1ea   : > { %p2751_p11 = pnand %p2750_p1, %p3964_p5  ;;  %p2758_p3 = por %p2757_p2, %p2756_p7 }
 0x1ec   : > { %p2752_p13 = pneg %p2751_p11 }
 0x1ee   : > { %p2759_p8 = pnand %p2758_p3, %p2752_p13 }
 0x254   : > { %v1087_v47 = vpop.permute.xlu1 %1086 }
 0x255   : > { %v1095_v49 = vsel %vm632_vm0, %v1087_v47, 0  ;;  %2362 = vmatprep.subr.msk.bf16.mxu1 %vm632_vm0, %v1087_v47 }
 0x256   : > { %v705_v53 = vpop.permute.xlu0 %704 }
 0x257   : > { %2283 = vmatmul.mubr.msk.bf16.vlgmr.msra.gmra.mrb[0].mxu1 %vm632_vm0, %v705_v53 }
 0x258   : > { %2295 = vmatpush3.bf16.xpose.msra.mxu1 %v1095_v49  ;;  %v1148_v57 = vpop.permute.xlu1 %1147  ;;  %2296 = vmatprep.mubr.msk.bf16.mxu1 %vm632_vm0, %v1079_v54 }
 0x259   : > { %v1156_v59 = vsel %vm632_vm0, %v1148_v57, 0  ;;  %2363 = vmatprep.subr.msk.bf16.mxu0 %vm632_vm0, %v1148_v57 }
 0x25a   : > { %v796_v63 = vpop.permute.xlu0 %795 }
 0x25b   : > { %2291 = vmatmul.mubr.msk.bf16.vlgmr.msra.gmra.mrb[4].mxu0 %vm632_vm0, %v796_v63 }
 0x25c   : > { %2301 = vmatpush3.bf16.xpose.msra.mxu0 %v1156_v59  ;;  %2302 = vmatprep.mubr.msk.bf16.mxu0 %vm632_vm0, %v1081_v0 }
 0x25f   : > { %2297 = vmatmul.mubr.msk.bf16.vlgmr.msra.gmra.mrb[4].mxu1 %vm632_vm0, %v1080_v1 }
 0x263   : > { %2303 = vmatmul.mubr.msk.bf16.vlgmr.msra.gmra.mrb[8].mxu0 %vm632_vm0, %v1082_v4 }
 0x32a   : > { %v755_v5 = vpop.f32.mrb[0].mxu1 }
 0x32b   : > { %v2284_v6 = vpop.f32.mrb[1].mxu1 }
 0x32c   : > { %v758_v7 = vpop.f32.mrb[2].mxu1  ;;  %v3443_v6 = vadd.f32 %v2199_v36, %v755_v5 }
 0x32d   : > { %v2285_v8 = vpop.f32.mrb[3].mxu1  ;;  %v759_v40 = vadd.f32 %v2199_v36, %v758_v7 }
 0x32e   : > { %v3359_v9 = vpop.f32.mrb[4].mxu0 }
 0x32f   : > { %v2292_v11 = vpop.f32.mrb[5].mxu0  ;;  %v2204_v56 = vmul.f32 -1.442695, %v759_v40 }
 0x330   : > { %v3361_v12 = vpop.f32.mrb[6].mxu0 }
 0x331   : > { %v2293_v13 = vpop.f32.mrb[7].mxu0  ;;  %2478 = vpow2.f32 %v2204_v56 }
 0x332   : > { %v2298_v16 = vpop.f32.mrb[4].mxu1 }
 0x333   : > { %v1225_v18 = vsub.f32 0.0, %v2298_v16  ;;  %v3365_v21 = vpop.f32.mrb[5].mxu1  ;;  %v1209_v24 = vmax.f32 %v2298_v16, 0.0 }
 0x334   : > { %v1207_v25 = vmax.f32 %v3365_v21, 0.0  ;;  %v1223_v26 = vsub.f32 0.0, %v3365_v21  ;;  %v3369_v27 = vpop.f32.mrb[6].mxu1 }
 0x335   : > { %v1210_v28 = vmax.f32 %v3369_v27, 0.0  ;;  %v3372_v29 = vpop.f32.mrb[7].mxu1  ;;  %v1226_v33 = vsub.f32 0.0, %v3369_v27  ;;  %v3384_v37 = vmax.f32 %v1225_v18, 0.0  ;;  %v3389_v41 = vmul.f32 %v1209_v24, %v881_v17 }
 0x336   : > { %v3374_v30 = vmax.f32 %v1223_v26, 0.0  ;;  %v3378_v31 = vmul.f32 %v1207_v25, %v881_v17  ;;  %v1208_v34 = vmax.f32 %v3372_v29, 0.0  ;;  %v3382_v35 = vpop.f32.mrb[8].mxu0  ;;  %v1224_v38 = vsub.f32 0.0, %v3372_v29 }
 0x337   : > { %v3387_v39 = vpop.f32.mrb[9].mxu0  ;;  %v3400_v45 = vmax.f32 %v1226_v33, 0.0  ;;  %v3410_v49 = vmul.f32 %v1210_v28, %v881_v17  ;;  %v1213_v51 = vmax.f32 %v3382_v35, 0.0  ;;  %v3416_v52 = vmul.f32 %v3384_v37, %v881_v17 }
 0x338   : > { %v3393_v42 = vmul.f32 %v1208_v34, %v881_v17  ;;  %v3395_v43 = vpop.f32.mrb[10].mxu0  ;;  %v3398_v44 = vmul.f32 %v3374_v30, %v881_v17  ;;  %v3402_v46 = vmax.f32 %v1224_v38, 0.0  ;;  %v1617_v48 = vsel %vm1247_vm2, %v3378_v31, 0.0 }
 0x339   : > { %v3404_v47 = vpop.f32.mrb[11].mxu0  ;;  %v1620_v57 = vsel %vm1247_vm2, %v3389_v41, 0.0  ;;  %v1229_v58 = vsub.f32 0.0, %v3382_v35  ;;  %v1211_v59 = vmax.f32 %v3387_v39, 0.0  ;;  %v3434_v62 = vmul.f32 %v3400_v45, %v881_v17 }
 0x33a   : > { %v1618_v50 = vsel %vm1247_vm2, %v3393_v42, 0.0  ;;  %v3419_v53 = vmul.f32 %v3402_v46, %v881_v17  ;;  %v1655_v61 = vsel %vm1247_vm2, %v3398_v44, 0.0  ;;  %v1622_v1 = vsel %vm1247_vm2, %v3410_v49, 0.0 }
 0x33b   : > { %v1619_v54 = vadd.f32 %v1618_v50, %v1617_v48  ;;  %v3440_v3 = vmul.f32 %v1213_v51, %v882_v55  ;;  %v1227_v4 = vsub.f32 0.0, %v3387_v39  ;;  %v1658_v7 = vsel %vm1247_vm2, %v3416_v52, 0.0 }
 0x33c   : > { %v1656_v0 = vsel %vm1247_vm2, %v3419_v53, 0.0  ;;  %v3448_v11 = vmul.f32 %v1209_v24, %v3429_v60  ;;  %v3450_v16 = vmax.f32 %v1229_v58, 0.0  ;;  %v3454_v18 = vmul.f32 %v1211_v59, %v882_v55 }
 0x33d   : > { %v1621_v63 = vadd.f32 %v1620_v57, %v1619_v54  ;;  %v1657_v2 = vadd.f32 %v1656_v0, %v1655_v61  ;;  %v3452_v17 = vmax.f32 %v1227_v4, 0.0  ;;  %v1660_v5 = vsel %vm1247_vm2, %v3434_v62, 0.0  ;;  %v3475_v54 = vld [vmem:[%s510_s10 + $0x8] sm:$0xff] }
 0x33e   : > { %v1254_v33 = vsel %vm1247_vm2, %v3448_v11, 0.0  ;;  %v1633_v24 = vsel %vm1247_vm2, %v3440_v3, 0.0  ;;  %v1214_v38 = vmax.f32 %v3395_v43, 0.0  ;;  %v1230_v40 = vsub.f32 0.0, %v3395_v43 }
 0x33f   : > { %v1623_v8 = vadd.f32 %v1622_v1, %v1621_v63  ;;  %v1659_v13 = vadd.f32 %v1658_v7, %v1657_v2  ;;  %v3463_v36 = vmul.f32 %v3452_v17, %v882_v55  ;;  %1255 = vadd.xlane.f32.xlu1 %v1254_v33  ;;  %v3470_v48 = vmul.f32 %v1207_v25, %v3429_v60 }
 0x340   : > { %v1212_v50 = vmax.f32 %v3404_v47, 0.0  ;;  %v3478_v57 = vmul.f32 %v3450_v16, %v882_v55  ;;  %v1630_v58 = vsel %vm1247_vm2, %v3454_v18, 0.0  ;;  %v1228_v61 = vsub.f32 0.0, %v3404_v47 }
 0x341   : > { %v1624_v26 = vrot.slane %v1623_v8, 4  ;;  %v1661_v35 = vadd.f32 %v1660_v5, %v1659_v13  ;;  %v1238_v63 = vmax.f32 %v1230_v40, 0.0  ;;  %v1248_v21 = vsel %vm1247_vm2, %v3470_v48, 0.0 }
 0x342   : > { %v3485_v25 = vmul.f32 %v1212_v50, %v882_v55  ;;  %v1668_v1 = vsel %vm1247_vm2, %v3463_v36, 0.0  ;;  %1249 = vadd.xlane.f32.xlu0 %v1248_v21  ;;  %v1236_v2 = vmax.f32 %v1228_v61, 0.0  ;;  %v3490_v4 = vmul.f32 %v1213_v51, %v3475_v54 }
 0x343   : > { %v1625_v39 = vadd.f32 %v1624_v26, %v1623_v8  ;;  %v1662_v56 = vrot.slane %v1661_v35, 4  ;;  %v3492_v8 = vmul.f32 %v1214_v38, %v882_v55  ;;  %v3497_v13 = vmul.f32 %v1211_v59, %v3475_v54 }
 0x344   : > { %v1631_v47 = vsel %vm1247_vm2, %v3485_v25, 0.0  ;;  %v3499_v26 = vmul.f32 %v1236_v2, %v882_v55  ;;  %v3523_v29 = vmul.f32 %v3374_v30, %v3429_v60  ;;  %v1671_v27 = vsel %vm1247_vm2, %v3478_v57, 0.0 }
 0x345   : > { %v1626_v43 = vrot.slane %v1625_v39, 2  ;;  %v1663_v0 = vadd.f32 %v1662_v56, %v1661_v35  ;;  %v1632_v33 = vadd.f32 %v1631_v47, %v1630_v58  ;;  %v1266_v35 = vsel %vm1247_vm2, %v3490_v4, 0.0 }
 0x346   : > { %v3503_v56 = vmul.f32 %v1238_v63, %v882_v55  ;;  %1267 = vadd.xlane.f32.xlu1 %v1266_v35  ;;  %v1260_v51 = vsel %vm1247_vm2, %v3497_v13, 0.0  ;;  %v1669_v58 = vsel %vm1247_vm2, %v3499_v26, 0.0  ;;  %v3517_v55 = vmul.f32 %v1210_v28, %v3429_v60 }
 0x347   : > { %v1627_v7 = vadd.f32 %v1626_v43, %v1625_v39  ;;  %v1664_v5 = vrot.slane %v1663_v0, 2  ;;  %v3510_v39 = vmul.f32 %v1208_v34, %v3429_v60  ;;  %v1634_v61 = vadd.f32 %v1633_v24, %v1632_v33  ;;  %1261 = vadd.xlane.f32.xlu0 %v1260_v51  ;;  %v2479_v43 = vpop.eup %2478  ;;  %v3528_v34 = vld [vmem:[%s3959_s25] ss:$0 sm:$0xff] }
 0x348   : > { %v1635_v47 = vsel %vm1247_vm2, %v3492_v8, 0.0  ;;  %v1670_v35 = vadd.f32 %v1669_v58, %v1668_v1  ;;  %v1257_v30 = vsel %vm1247_vm2, %v3517_v55, 0.0  ;;  %v3537_v1 = vmul.f32 %v1214_v38, %v3475_v54 }
 0x349   : > { %v1628_v40 = vrot.slane %v1627_v7, 1  ;;  %v1665_v59 = vadd.f32 %v1664_v5, %v1663_v0  ;;  %v1636_v28 = vadd.f32 %v1635_v47, %v1634_v61  ;;  %v1251_v0 = vsel %vm1247_vm2, %v3510_v39, 0.0 }
 0x34a   : > { %v1672_v5 = vadd.f32 %v1671_v27, %v1670_v35  ;;  %1252 = vadd.xlane.f32.xlu1 %v1251_v0  ;;  %v2203_v33 = vmul.f32 -1.442695, %v3443_v6  ;;  %v1673_v51 = vsel %vm1247_vm2, %v3503_v56, 0.0  ;;  %v847_v61 = vadd.f32 %v3528_v34, %v3359_v9 }
 0x34b   : > { %v1629_v21 = vadd.f32 %v1628_v40, %v1627_v7  ;;  %v1666_v24 = vrot.slane %v1665_v59, 1  ;;  %v1637_v58 = vrot.slane %v1636_v28, 4  ;;  %1258 = vadd.xlane.f32.xlu0 %v1257_v30  ;;  %v1296_v47 = vsel %vm1247_vm2, %v3523_v29, 0.0 }
 0x34c   : > { %v3547_v38 = vmul.f32 %v1212_v50, %v3475_v54  ;;  %v3550_v6 = vmul.f32 %v1236_v2, %v3475_v54  ;;  %v3556_v9 = vmul.f32 %v3400_v45, %v3429_v60  ;;  %v3559_v0 = vmul.f32 %v1238_v63, %v3475_v54 }
 0x34d   : > { %v1643_v7 = vadd.f32 1e-09, %v1629_v21  ;;  %v1667_v40 = vadd.f32 %v1666_v24, %v1665_v59  ;;  %v1674_v21 = vadd.f32 %v1673_v51, %v1672_v5  ;;  %v1638_v27 = vadd.f32 %v1637_v58, %v1636_v28 }
 0x34e   : > { %1297 = vadd.xlane.f32.xlu1 %v1296_v47  ;;  %v1269_v24 = vsel %vm1247_vm2, %v3537_v1, 0.0  ;;  %v3563_v50 = vmul.f32 %v3384_v37, %v3429_v60  ;;  %v769_v2 = vadd.f32 1.0, %v2479_v43  ;;  %v3567_v5 = vmul.f32 %v3450_v16, %v3475_v54 }
 0x34f   : > { %2480 = vrcp.f32 %v1643_v7  ;;  %v1681_v35 = vadd.f32 1e-09, %v1667_v40  ;;  %v1675_v59 = vrot.slane %v1674_v21, 4  ;;  %v1639_v28 = vrot.slane %v1638_v27, 2  ;;  %1270 = vadd.xlane.f32.xlu0 %v1269_v24 }
 0x350   : > { %v2209_v30 = vmul.f32 -1.442695, %v847_v61  ;;  %v1263_v63 = vsel %vm1247_vm2, %v3547_v38, 0.0  ;;  %v3573_v51 = vmul.f32 %v3402_v46, %v3429_v60 }
 0x351   : > { %2482 = vrcp.f32 %v1681_v35  ;;  %v1676_v7 = vadd.f32 %v1675_v59, %v1674_v21  ;;  %v1640_v45 = vadd.f32 %v1639_v28, %v1638_v27 }
 0x352   : > { %2484 = vpow2.f32 %v2203_v33  ;;  %v1299_v33 = vsel %vm1247_vm2, %v3573_v51, 0.0 }
 0x353   : > { %v1677_v40 = vrot.slane %v1676_v7, 2  ;;  %v1641_v58 = vrot.slane %v1640_v45, 1  ;;  %1264 = vadd.xlane.f32.xlu0 %v1263_v63  ;;  %2486 = vrcp.f32 %v769_v2 }
 0x354   : > { %2488 = vpow2.f32 %v2209_v30 }
 0x355   : > { %v1678_v37 = vadd.f32 %v1677_v40, %v1676_v7  ;;  %v1642_v43 = vadd.f32 %v1641_v58, %v1640_v45 }
 0x357   : > { %v1679_v16 = vrot.slane %v1678_v37, 1  ;;  %v1644_v61 = vadd.f32 1e-09, %v1642_v43  ;;  %1300 = vadd.xlane.f32.xlu0 %v1299_v33 }
 0x359   : > { %v2481_v21 = vpop.eup %2480  ;;  %v1680_v60 = vadd.f32 %v1679_v16, %v1678_v37  ;;  %2490 = vrcp.f32 %v1644_v61 }
 0x35a   : > { %v3578_v47 = vmul.f32 %v2481_v21, %v3378_v31  ;;  %v3581_v35 = vmul.f32 %v2481_v21, %v3393_v42  ;;  %v3584_v46 = vmul.f32 %v2481_v21, %v3389_v41  ;;  %v3587_v27 = vmul.f32 %v2481_v21, %v3410_v49 }
 0x35b   : > { %v2483_v59 = vpop.eup %2482  ;;  %v1682_v28 = vadd.f32 1e-09, %v1680_v60 }
 0x35c   : > { %v1693_v24 = vpack.c.bf16 %v3581_v35, %v3578_v47  ;;  %v1694_v31 = vpack.c.bf16 %v3587_v27, %v3584_v46  ;;  %v3594_v2 = vmul.f32 %v2483_v59, %v3398_v44  ;;  %v3597_v42 = vmul.f32 %v2483_v59, %v3419_v53  ;;  %v2485_v41 = vpop.eup %2484 }
 0x35d   : > { %v3600_v7 = vmul.f32 %v2483_v59, %v3416_v52  ;;  %v3603_v49 = vmul.f32 %v2483_v59, %v3434_v62  ;;  %2492 = vrcp.f32 %v1682_v28  ;;  %v2487_v40 = vpop.eup %2486  ;;  %v768_v44 = vadd.f32 1.0, %v2485_v41 }
 0x35e   : > { %v1827_v30 = vpack.c.bf16 %v3597_v42, %v3594_v2  ;;  %v2489_v63 = vpop.eup %2488 }
 0x35f   : > { %v1828_v45 = vpack.c.bf16 %v3603_v49, %v3600_v7  ;;  %778 = vrot.lane.b32.xlu1 %v2487_v40, %s2844_s12  ;;  %2494 = vrcp.f32 %v768_v44  ;;  %v859_v53 = vadd.f32 1.0, %v2489_v63  ;;  %v1311_v44 = vsel %vm1247_vm2, %v3550_v6, 0.0 }
 0x360   : > { %v1314_v63 = vsel %vm1247_vm2, %v3567_v5, 0.0 }
 0x361   : > { %2496 = vrcp.f32 %v859_v53 }
 0x363   : > { %v2491_v58 = vpop.eup %2490 }
 0x364   : > { %v3611_v52 = vmul.f32 %v2491_v58, %v3454_v18  ;;  %v3614_v62 = vmul.f32 %v2491_v58, %v3485_v25  ;;  %v3617_v37 = vmul.f32 %v2491_v58, %v3440_v3  ;;  %v3620_v43 = vmul.f32 %v2491_v58, %v3492_v8 }
 0x366   : > { %v1695_v16 = vpack.c.bf16 %v3614_v62, %v3611_v52  ;;  %v1696_v33 = vpack.c.bf16 %v3620_v43, %v3617_v37 }
 0x367   : > { %v2493_v21 = vpop.eup %2492 }
 0x368   : > { %v3627_v18 = vmul.f32 %v2493_v21, %v3463_v36  ;;  %v3630_v25 = vmul.f32 %v2493_v21, %v3499_v26  ;;  %v3633_v3 = vmul.f32 %v2493_v21, %v3478_v57  ;;  %v3636_v8 = vmul.f32 %v2493_v21, %v3503_v56 }
 0x369   : > { %v2495_v59 = vpop.eup %2494  ;;  %v850_v26 = vadd.f32 %v3528_v34, %v3361_v12  ;;  %v3648_v56 = vmul.f32 %v3452_v17, %v3475_v54  ;;  %v1305_v34 = vsel %vm1247_vm2, %v3556_v9, 0.0  ;;  %v1317_v17 = vsel %vm1247_vm2, %v3559_v0, 0.0 }
 0x36a   : > { %v1829_v61 = vpack.c.bf16 %v3630_v25, %v3627_v18  ;;  %v1302_v54 = vsel %vm1247_vm2, %v3563_v50, 0.0  ;;  %v3960_v27 = vpack.c.bf16 %v3636_v8, %v3633_v3 }
 0x36b   : > { %v2497_v36 = vpop.eup %2496  ;;  %v2210_v57 = vmul.f32 -1.442695, %v850_v26  ;;  %v1308_v41 = vsel %vm1247_vm2, %v3648_v56, 0.0 }
 0x36d   : > { %776 = vrot.lane.b32.xlu0 %v2495_v59, %s2844_s12  ;;  %2498 = vpow2.f32 %v2210_v57 }
 0x371   : > { %867 = vrot.lane.b32.xlu0 %v2497_v36, %s2843_s1 }
 0x377   : > { %v2499_v28 = vpop.eup %2498 }
 0x378   : > { %v860_v40 = vadd.f32 1.0, %v2499_v28 }
 0x37a   : > { %2500 = vrcp.f32 %v860_v40 }
 0x383   : > { %1309 = vadd.xlane.f32.xlu1 %v1308_v41 }
 0x384   : > { %v2501_v12 = vpop.eup %2500 }
 0x390   : > { %1312 = vadd.xlane.f32.xlu0 %v1311_v44 }
 0x394   : > { %869 = vrot.lane.b32.xlu1 %v2501_v12, %s2843_s1  ;;  %1306 = vadd.xlane.f32.xlu0 %v1305_v34 }
 0x398   : > { %1318 = vadd.xlane.f32.xlu0 %v1317_v17 }
 0x3b8   : > { %1303 = vadd.xlane.f32.xlu1 %v1302_v54 }
 0x3bc   : > { %1315 = vadd.xlane.f32.xlu1 %v1314_v63 }
 0x3cc   : > { %v1256_v53 = vpop.xlane.xlu1 %1255 }
 0x3cd   : > { %v1274_v26 = vadd.f32 1e-09, %v1256_v53 }
 0x3cf   : > { %v1250_v58 = vpop.xlane.xlu0 %1249 }
 0x3d0   : > { %v1272_v59 = vadd.f32 1e-09, %v1250_v58 }
 0x3d2   : > { %2502 = vrcp.f32 %v1272_v59 }
 0x3d3   : > { %v1268_v21 = vpop.xlane.xlu1 %1267  ;;  %2504 = vrcp.f32 %v1274_v26 }
 0x3d4   : > { %v1262_v36 = vpop.xlane.xlu0 %1261  ;;  %v1278_v40 = vadd.f32 1e-09, %v1268_v21 }
 0x3d5   : > { %v1276_v17 = vadd.f32 1e-09, %v1262_v36 }
 0x3d7   : > { %v1253_v57 = vpop.xlane.xlu1 %1252 }
 0x3d8   : > { %v1273_v28 = vadd.f32 1e-09, %v1253_v57  ;;  %v1259_v41 = vpop.xlane.xlu0 %1258 }
 0x3d9   : > { %v1275_v44 = vadd.f32 1e-09, %v1259_v41 }
 0x3da   : > { %2506 = vrcp.f32 %v1273_v28 }
 0x3db   : > { %2508 = vrcp.f32 %v1275_v44  ;;  %v1298_v12 = vpop.xlane.xlu1 %1297 }
 0x3dc   : > { %v1271_v34 = vpop.xlane.xlu0 %1270  ;;  %2510 = vrcp.f32 %v1278_v40  ;;  %v1320_v53 = vadd.f32 1e-09, %v1298_v12  ;;  %v2503_v57 = vpop.eup %2502 }
 0x3dd   : > { %v1279_v54 = vadd.f32 1e-09, %v1271_v34  ;;  %v2505_v26 = vpop.eup %2504  ;;  %v1288_v40 = vmul.f32 %v2503_v57, %v3470_v48 }
 0x3de   : > { %v3668_v34 = vmul.f32 %v2505_v26, %v3448_v11 }
 0x3df   : > { %2512 = vrcp.f32 %v1279_v54  ;;  %v779_v63 = vpop.permute.xlu1 %778 }
 0x3e0   : > { %v783_v58 = vmul.f32 %v779_v63, %v3310_v22  ;;  %v1265_v10 = vpop.xlane.xlu0 %1264  ;;  %2514 = vrcp.f32 %v1276_v17 }
 0x3e1   : > { %v1277_v59 = vadd.f32 1e-09, %v1265_v10 }
 0x3e2   : > { %v1349_v60 = vpack.c.bf16 %v783_v58, %v783_v58 }
 0x3e3   : > { %2516 = vrcp.f32 %v1277_v59 }
 0x3e4   : > { %v2507_v21 = vpop.eup %2506  ;;  %1413 = vrot.lane.b32.xlu0 %v1349_v60, %s2844_s12  ;;  %v1301_v28 = vpop.xlane.xlu0 %1300  ;;  %2518 = vrcp.f32 %v1320_v53 }
 0x3e5   : > { %v2509_v41 = vpop.eup %2508  ;;  %v1321_v36 = vadd.f32 1e-09, %v1301_v28  ;;  %v1289_v44 = vmul.f32 %v2507_v21, %v3510_v39 }
 0x3e6   : > { %v3671_v10 = vmul.f32 %v2509_v41, %v3517_v55  ;;  %v2511_v12 = vpop.eup %2510 }
 0x3e7   : > { %2520 = vrcp.f32 %v1321_v36  ;;  %v1344_v17 = vpack.c.bf16 %v1289_v44, %v1288_v40  ;;  %v1294_v48 = vmul.f32 %v2511_v12, %v3490_v4 }
 0x3e8   : > { %v777_v54 = vpop.permute.xlu0 %776  ;;  %v1345_v60 = vpack.c.bf16 %v3671_v10, %v3668_v34 }
 0x3e9   : > { %v2513_v63 = vpop.eup %2512  ;;  %v782_v58 = vmul.f32 %v777_v54, %v3306_v19  ;;  %2308 = vmatprep.mubr.msk.bf16.mxu1 %vm1247_vm2, %v1344_v17 }
 0x3ea   : > { %v1295_v11 = vmul.f32 %v2513_v63, %v3537_v1  ;;  %v2515_v39 = vpop.eup %2514 }
 0x3eb   : > { %v1348_v53 = vpack.c.bf16 %v782_v58, %v782_v58  ;;  %v1292_v21 = vmul.f32 %v2515_v39, %v3497_v13  ;;  %v2214_v39 = vld.sshfl [vmem:[%s3264_s15 + $0x4] sm:$0x33 pattern:$0x75316420] }
 0x3ec   : > { %v868_v55 = vpop.permute.xlu0 %867  ;;  %v1347_v59 = vpack.c.bf16 %v1295_v11, %v1294_v48 }
 0x3ed   : > { %v2517_v57 = vpop.eup %2516  ;;  %v873_v26 = vmul.f32 %v868_v55, %v3306_v19  ;;  %1351 = vrot.lane.b32.xlu1 %v1348_v53, %s2844_s12  ;;  %v1014_v53 = vcombine.high %v2214_v39, %v2214_v39 }
 0x3ee   : > { %v1293_v28 = vmul.f32 %v2517_v57, %v3547_v38  ;;  %v2519_v41 = vpop.eup %2518 }
 0x3ef   : > { %v1477_v36 = vpack.c.bf16 %v873_v26, %v873_v26  ;;  %v1336_v4 = vmul.f32 %v2519_v41, %v3523_v29  ;;  %v1028_v55 = vrot.slane %v1014_v53, %v3326_v32 }
 0x3f0   : > { %v1346_v40 = vpack.c.bf16 %v1293_v28, %v1292_v21 }
 0x3f1   : > { %v2521_v44 = vpop.eup %2520  ;;  %1480 = vrot.lane.b32.xlu1 %v1477_v36, %s2845_s9  ;;  %v1030_v57 = vcombine.high %v1028_v55, %v1028_v55 }
 0x3f2   : > { %2314 = vmatprep.mubr.msk.bf16.mxu0 %vm1247_vm2, %v1346_v40  ;;  %v1337_v1 = vmul.f32 %v2521_v44, %v3573_v51  ;;  %v1054_v40 = vrot.slane %v1028_v55, %v3296_v15 }
 0x3f3   : > { %v1062_v36 = vrot.slane %v1030_v57, %v3296_v15 }
 0x3f4   : > { %v1473_v12 = vpack.c.bf16 %v1337_v1, %v1336_v4 }
 0x402   : > { %1709 = vxpose.xlu0.c.b16.start [1/2] (short) (narrow) %v1693_v24, 16 }
 0x406   : > { %1710 = vxpose.xlu0.c.b16.end [2/2] (short) (narrow) %v1694_v31, 16 }
 0x40a   : > { %1843 = vxpose.xlu0.c.b16.start [1/2] (short) (narrow) %v1827_v30, 16 }
 0x40e   : > { %1844 = vxpose.xlu0.c.b16.end [2/2] (short) (narrow) %v1828_v45, 16 }
 0x410   : > { %v1310_v13 = vpop.xlane.xlu1 %1309 }
 0x411   : > { %v1324_v46 = vadd.f32 1e-09, %v1310_v13 }
 0x414   : > { %v870_v29 = vpop.permute.xlu1 %869 }
 0x415   : > { %v874_v38 = vmul.f32 %v870_v29, %v3310_v22 }
 0x417   : > { %v1478_v51 = vpack.c.bf16 %v874_v38, %v874_v38 }
 0x419   : > { %1541 = vrot.lane.b32.xlu1 %v1478_v51, %s2845_s9  ;;  %v3760_v51 = vadd.f32 %v1062_v36, %v3310_v22 }
 0x41d   : > { %v1313_v47 = vpop.xlane.xlu0 %1312 }
 0x41e   : > { %v1325_v35 = vadd.f32 1e-09, %v1313_v47 }
 0x420   : > { %2522 = vrcp.f32 %v1325_v35 }
 0x421   : > { %2524 = vrcp.f32 %v1324_v46  ;;  %v1307_v24 = vpop.xlane.xlu0 %1306  ;;  %v3764_v46 = vadd.f32 %v1054_v40, %v3310_v22 }
 0x422   : > { %v1323_v52 = vadd.f32 1e-09, %v1307_v24 }
 0x425   : > { %v1319_v31 = vpop.xlane.xlu0 %1318 }
 0x426   : > { %v1327_v10 = vadd.f32 1e-09, %v1319_v31 }
 0x42a   : > { %v2523_v42 = vpop.eup %2522 }
 0x42b   : > { %v2525_v7 = vpop.eup %2524  ;;  %v1341_v45 = vmul.f32 %v2523_v42, %v3550_v6 }
 0x42c   : > { %v1340_v37 = vmul.f32 %v2525_v7, %v3648_v56  ;;  %v3961_v56 = vmov 0.0  }
 0x42e   : > { %v1475_v43 = vpack.c.bf16 %v1341_v45, %v1340_v37 }
 0x43c   : > { %1768 = vxpose.xlu1.c.b16.start [1/2] (short) (narrow) %v1695_v16, 16 }
 0x440   : > { %1769 = vxpose.xlu1.c.b16.end [2/2] (short) (narrow) %v1696_v33, 16 }
 0x444   : > { %1902 = vxpose.xlu1.c.b16.start [1/2] (short) (narrow) %v1829_v61, 16 }
 0x445   : > { %v1304_v2 = vpop.xlane.xlu1 %1303 }
 0x446   : > { %v1322_v49 = vadd.f32 1e-09, %v1304_v2 }
 0x448   : > { %1903 = vxpose.xlu1.c.b16.end [2/2] (short) (narrow) %v3960_v27, 16  ;;  %2526 = vrcp.f32 %v1322_v49 }
 0x449   : > { %2528 = vrcp.f32 %v1323_v52  ;;  %v1316_v16 = vpop.xlane.xlu1 %1315 }
 0x44a   : > { %v1326_v34 = vadd.f32 1e-09, %v1316_v16 }
 0x44c   : > { %2530 = vrcp.f32 %v1326_v34 }
 0x44d   : > { %2532 = vrcp.f32 %v1327_v10 }
 0x452   : > { %v2527_v6 = vpop.eup %2526 }
 0x453   : > { %v2529_v8 = vpop.eup %2528  ;;  %v1338_v61 = vmul.f32 %v2527_v6, %v3563_v50 }
 0x454   : > { %v1339_v17 = vmul.f32 %v2529_v8, %v3556_v9 }
 0x456   : > { %v1414_v30 = vpop.permute.xlu0 %1413  ;;  %v1474_v54 = vpack.c.bf16 %v1339_v17, %v1338_v61 }
 0x457   : > { %v1422_v62 = vsel %vm1359_vm3, %v1414_v30, 0  ;;  %2365 = vmatprep.subr.msk.bf16.mxu0 %vm1359_vm3, %v1414_v30 }
 0x458   : > { %2313 = vmatpush3.bf16.msra.mxu0 %v1422_v62 }
 0x45b   : > { %2315 = vmatmul.mubr.msk.bf16.vlgmr.msra.gmra.mrb[12].mxu0 %vm1247_vm2, %v1347_v59  ;;  %v2213_v59 = vld.sshfl [vmem:[%s3264_s15] sm:$0x33 pattern:$0x75316420] }
 0x45c   : > { %2326 = vmatprep.mubr.msk.bf16.mxu0 %vm1247_vm2, %v1475_v43  ;;  %v990_v26 = vcombine.high %v2213_v59, %v2213_v59  ;;  %v997_v41 = vrot.slane %v2213_v59, %v3326_v32 }
 0x45e   : > { %v1004_v44 = vrot.slane %v990_v26, %v3326_v32  ;;  %v1005_v13 = vcombine.high %v997_v41, %v997_v41  ;;  %v1034_v30 = vrot.slane %v997_v41, %v3296_v15 }
 0x45f   : > { %v1352_v33 = vpop.permute.xlu1 %1351 }
 0x460   : > { %v1361_v18 = vsel %vm1359_vm3, %v1352_v33, 0  ;;  %2364 = vmatprep.subr.msk.bf16.mxu1 %vm1359_vm3, %v1352_v33  ;;  %v1042_v7 = vrot.slane %v1005_v13, %v3296_v15  ;;  %v1038_v62 = vrot.slane %v1004_v44, %v3296_v15  ;;  %v1071_v33 = vadd.f32 %v1034_v30, %v3306_v19 }
 0x461   : > { %2307 = vmatpush3.bf16.msra.mxu1 %v1361_v18 }
 0x462   : > { %v1073_v43 = vadd.f32 %v1042_v7, %v3306_v19  ;;  %v1072_v61 = vadd.f32 %v1038_v62, %v3306_v19 }
 0x463   : > { %v1481_v25 = vpop.permute.xlu1 %1480 }
 0x464   : > { %v1489_v3 = vsel %vm1359_vm3, %v1481_v25, 0  ;;  %2309 = vmatmul.mubr.msk.bf16.vlgmr.msra.gmra.mrb[8].mxu1 %vm1247_vm2, %v1345_v60  ;;  %2366 = vmatprep.subr.msk.bf16.mxu1 %vm1359_vm3, %v1481_v25  ;;  %v2531_v60 = vpop.eup %2530 }
 0x465   : > { %2319 = vmatpush3.bf16.msra.mxu1 %v1489_v3  ;;  %2320 = vmatprep.mubr.msk.bf16.mxu1 %vm1247_vm2, %v1473_v12  ;;  %v2533_v63 = vpop.eup %2532  ;;  %v1342_v50 = vmul.f32 %v2531_v60, %v3567_v5  ;;  %v1021_v5 = vrot.slane %v2214_v39, %v3326_v32  ;;  %v1006_v32 = vcombine.high %v1004_v44, %v1004_v44 }
 0x466   : > { %2330 = vmatprep.subr.bf16.mxu1 %v3961_v56  ;;  %v1343_v48 = vmul.f32 %v2533_v63, %v3559_v0 }
 0x467   : > { %v1029_v0 = vcombine.high %v1021_v5, %v1021_v5  ;;  %v1050_v28 = vrot.slane %v1021_v5, %v3296_v15 }
 0x468   : > { %v1476_v11 = vpack.c.bf16 %v1343_v48, %v1342_v50 }
 0x469   : > { %v1058_v21 = vrot.slane %v1029_v0, %v3296_v15  ;;  %v3756_v12 = vadd.f32 %v1050_v28, %v3310_v22  ;;  %v1717_v28 = vpop.trf.xlu0 }
 0x46b   : > { %v3753_v4 = vadd.f32 %v1058_v21, %v3310_v22  ;;  %v1046_v22 = vrot.slane %v1006_v32, %v3296_v15 }
 0x46c   : > { %2321 = vmatmul.mubr.msk.bf16.vlgmr.msra.gmra.mrb[12].mxu1 %vm1247_vm2, %v1474_v54 }
 0x46d   : > { %2334 = vmatprep.mubr.msk.bf16.mxu1 %vm2842_vm1, %v3961_v56  ;;  %v1074_v25 = vadd.f32 %v1046_v22, %v3306_v19 }
 0x470   : > { %v1851_v40 = vpop.trf.xlu0 }
 0x48b   : > { %v1542_v58 = vpop.permute.xlu1 %1541 }
 0x48c   : > { %v1550_v9 = vsel %vm1359_vm3, %v1542_v58, 0  ;;  %2367 = vmatprep.subr.msk.bf16.mxu0 %vm1359_vm3, %v1542_v58 }
 0x48d   : > { %2325 = vmatpush3.bf16.msra.mxu0 %v1550_v9 }
 0x48e   : > { %2338 = vmatprep.subr.bf16.mxu0 %v3961_v56 }
 0x490   : > { %2327 = vmatmul.mubr.msk.bf16.vlgmr.msra.gmra.mrb[16].mxu0 %vm1247_vm2, %v1476_v11 }
 0x491   : > { %2342 = vmatprep.mubr.msk.bf16.mxu0 %vm2842_vm1, %v3961_v56 }
 0x4a2   : > { %v1776_v63 = vpop.trf.xlu1 }
 0x52e   : > { %v2316_v1 = vpop.f32.mrb[12].mxu0 }
 0x52f   : > { %v1467_v29 = vadd.f32 %v2316_v1, %v3753_v4  ;;  %v1458_v38 = vpop.f32.mrb[13].mxu0 }
 0x530   : > { %v1459_v47 = vadd.f32 %v1458_v38, %v3756_v12  ;;  %v2317_v35 = vpop.f32.mrb[14].mxu0 }
 0x531   : > { %v1703_v27 = vadd.f32 %v1467_v29, %v3753_v4  ;;  %v1470_v24 = vadd.f32 %v2317_v35, %v3760_v51  ;;  %v1461_v31 = vpop.f32.mrb[15].mxu0 }
 0x532   : > { %v1701_v2 = vadd.f32 %v1459_v47, %v3756_v12  ;;  %v1462_v42 = vadd.f32 %v1461_v31, %v3764_v46 }
 0x533   : > { %v1704_v49 = vadd.f32 %v1470_v24, %v3760_v51 }
 0x534   : > { %v1702_v45 = vadd.f32 %v1462_v42, %v3764_v46 }
 0x535   : > { %v1708_v52 = vpack.c.bf16 %v1704_v49, %v1703_v27  ;;  %v1910_v49 = vpop.trf.xlu1 }
 0x536   : > { %v1707_v37 = vpack.c.bf16 %v1702_v45, %v1701_v2 }
 0x537   : > { %v2310_v16 = vpop.f32.mrb[8].mxu1 }
 0x538   : > { %v1406_v18 = vadd.f32 %v2310_v16, %v1073_v43  ;;  %v1397_v6 = vpop.f32.mrb[9].mxu1  ;;  %2339 = vmatpush3.bf16.msra.mxu0 %v1707_v37 }
 0x539   : > { %v1398_v3 = vadd.f32 %v1397_v6, %v1071_v33  ;;  %v2311_v8 = vpop.f32.mrb[10].mxu1  ;;  %2340 = vmatprep.subr.bf16.mxu0 %v3961_v56 }
 0x53a   : > { %v1699_v17 = vadd.f32 %v1406_v18, %v1073_v43  ;;  %v1409_v54 = vadd.f32 %v2311_v8, %v1074_v25  ;;  %v1400_v15 = vpop.f32.mrb[11].mxu1 }
 0x53b   : > { %v1697_v34 = vadd.f32 %v1398_v3, %v1071_v33  ;;  %v1401_v10 = vadd.f32 %v1400_v15, %v1072_v61 }
 0x53c   : > { %v1700_v60 = vadd.f32 %v1409_v54, %v1074_v25  ;;  %2341 = vmatpush3.bf16.msra.mxu0 %v1708_v52 }
 0x53d   : > { %v1698_v50 = vadd.f32 %v1401_v10, %v1072_v61  ;;  %2354 = vmatprep.subr.bf16.mxu0 %v3961_v56 }
 0x53e   : > { %v1706_v58 = vpack.c.bf16 %v1700_v60, %v1699_v17 }
 0x53f   : > { %v1705_v48 = vpack.c.bf16 %v1698_v50, %v1697_v34  ;;  %v2322_v9 = vpop.f32.mrb[12].mxu1  ;;  %2343 = vmatmul.mubr.msk.bf16.vlgmr.msra.gmra.mrb[20].mxu0 %vm632_vm0, %v1776_v63 }
 0x540   : > { %v1534_v11 = vadd.f32 %v2322_v9, %v1073_v43  ;;  %v1525_v19 = vpop.f32.mrb[13].mxu1  ;;  %2358 = vmatprep.mubr.msk.bf16.mxu0 %vm2842_vm1, %v3961_v56 }
 0x541   : > { %v1526_v39 = vadd.f32 %v1525_v19, %v1071_v33  ;;  %v2323_v53 = vpop.f32.mrb[14].mxu1  ;;  %2331 = vmatpush3.bf16.msra.mxu1 %v1705_v48 }
 0x542   : > { %v1833_v5 = vadd.f32 %v1534_v11, %v1073_v43  ;;  %v1537_v55 = vadd.f32 %v2323_v53, %v1074_v25  ;;  %v1528_v0 = vpop.f32.mrb[15].mxu1  ;;  %2332 = vmatprep.subr.bf16.mxu1 %v3961_v56 }
 0x543   : > { %v1831_v59 = vadd.f32 %v1526_v39, %v1071_v33  ;;  %v1529_v57 = vadd.f32 %v1528_v0, %v1072_v61 }
 0x544   : > { %v1834_v26 = vadd.f32 %v1537_v55, %v1074_v25 }
 0x545   : > { %v1832_v21 = vadd.f32 %v1529_v57, %v1072_v61  ;;  %2333 = vmatpush3.bf16.msra.mxu1 %v1706_v58 }
 0x546   : > { %v1840_v41 = vpack.c.bf16 %v1834_v26, %v1833_v5  ;;  %2346 = vmatprep.subr.bf16.mxu1 %v3961_v56 }
 0x547   : > { %v1839_v36 = vpack.c.bf16 %v1832_v21, %v1831_v59 }
 0x548   : > { %2335 = vmatmul.mubr.msk.bf16.vlgmr.msra.gmra.mrb[16].mxu1 %vm632_vm0, %v1717_v28 }
 0x549   : > { %2347 = vmatpush3.bf16.msra.mxu1 %v1839_v36  ;;  %2350 = vmatprep.mubr.msk.bf16.mxu1 %vm2842_vm1, %v3961_v56 }
 0x54a   : > { %2348 = vmatprep.subr.bf16.mxu1 %v3961_v56 }
 0x54d   : > { %2349 = vmatpush3.bf16.msra.mxu1 %v1840_v41 }
 0x550   : > { %2351 = vmatmul.mubr.msk.bf16.vlgmr.msra.gmra.mrb[20].mxu1 %vm632_vm0, %v1851_v40 }
 0x563   : > { %v2328_v44 = vpop.f32.mrb[16].mxu0 }
 0x564   : > { %v1595_v1 = vadd.f32 %v2328_v44, %v3753_v4  ;;  %v1586_v13 = vpop.f32.mrb[17].mxu0 }
 0x565   : > { %v1587_v29 = vadd.f32 %v1586_v13, %v3756_v12  ;;  %v2329_v38 = vpop.f32.mrb[18].mxu0 }
 0x566   : > { %v1837_v47 = vadd.f32 %v1595_v1, %v3753_v4  ;;  %v1598_v35 = vadd.f32 %v2329_v38, %v3760_v51  ;;  %v1589_v32 = vpop.f32.mrb[19].mxu0  ;;  %v608_v4 = vsub.s32 1, %v3293_v14 }
 0x567   : > { %v1835_v27 = vadd.f32 %v1587_v29, %v3756_v12  ;;  %v1590_v24 = vadd.f32 %v1589_v32, %v3764_v46  ;;  %v2542_v12 = vld [vmem:[%s3958_s22] sm:$0x3] }
 0x568   : > { %v1838_v31 = vadd.f32 %v1598_v35, %v3760_v51  ;;  %v609_v30 = vrot.slane %v2542_v12, %v608_v4 }
 0x569   : > { %v1836_v2 = vadd.f32 %v1590_v24, %v3764_v46 }
 0x56a   : > { %v1842_v42 = vpack.c.bf16 %v1838_v31, %v1837_v47  ;;  %v677_v51 = vadd.f32 %v3312_v23, %v609_v30  ;;  %v673_v46 = vadd.f32 %v3308_v20, %v609_v30 }
 0x56b   : > { %v1841_v7 = vpack.c.bf16 %v1836_v2, %v1835_v27 }
 0x56c   : > { %v2198_v45 = vmul.f32 -1.442695, %v677_v51  ;;  %v2197_v22 = vmul.f32 -1.442695, %v673_v46 }
 0x56d   : > { %2355 = vmatpush3.bf16.msra.mxu0 %v1841_v7 }
 0x56e   : > { %2356 = vmatprep.subr.bf16.mxu0 %v3961_v56  ;;  %2534 = vpow2.f32 %v2198_v45 }
 0x56f   : > { %2536 = vpow2.f32 %v2197_v22 }
 0x571   : > { %2357 = vmatpush3.bf16.msra.mxu0 %v1842_v42 }
 0x574   : > { %2359 = vmatmul.mubr.msk.bf16.vlgmr.msra.gmra.mrb[24].mxu0 %vm632_vm0, %v1910_v49 }
 0x578   : > { %v2535_v56 = vpop.eup %2534 }
 0x579   : > { %v686_v52 = vadd.f32 1.0, %v2535_v56  ;;  %v2537_v62 = vpop.eup %2536 }
 0x57a   : > { %v685_v37 = vadd.f32 1.0, %v2537_v62 }
 0x57b   : > { %2538 = vrcp.f32 %v686_v52 }
 0x57c   : > { %2540 = vrcp.f32 %v685_v37 }
 0x585   : > { %v2539_v14 = vpop.eup %2538 }
 0x586   : > { %v2541_v23 = vpop.eup %2540  ;;  %v1964_v50 = vsub.f32 1.0, %v2539_v14 }
 0x587   : > { %v1963_v17 = vsub.f32 1.0, %v2541_v23 }
 0x612   : > { %v1821_v43 = vpop.f32.mrb[20].mxu0 }
 0x613   : > { %v1962_v16 = vmul.f32 %v2539_v14, %v1821_v43  ;;  %v2344_v33 = vpop.f32.mrb[21].mxu0 }
 0x614   : > { %v1824_v18 = vpop.f32.mrb[22].mxu0 }
 0x615   : > { %v2345_v6 = vpop.f32.mrb[23].mxu0 }
 0x61b   : > { %v1762_v25 = vpop.f32.mrb[16].mxu1 }
 0x61c   : > { %v1961_v3 = vmul.f32 %v2541_v23, %v1762_v25  ;;  %v2336_v20 = vpop.f32.mrb[17].mxu1 }
 0x61d   : > { %v1765_v8 = vpop.f32.mrb[18].mxu1 }
 0x61e   : > { %v2337_v61 = vpop.f32.mrb[19].mxu1 }
 0x623   : > { %v1896_v54 = vpop.f32.mrb[20].mxu1 }
 0x624   : > { %v1965_v15 = vmul.f32 %v1963_v17, %v1896_v54  ;;  %v2352_v34 = vpop.f32.mrb[21].mxu1 }
 0x625   : > { %v1899_v10 = vpop.f32.mrb[22].mxu1 }
 0x626   : > { %v1967_v60 = vadd.f32 %v1965_v15, %v1961_v3  ;;  %v2353_v63 = vpop.f32.mrb[23].mxu1 }
 0x628   : > { %1969 = vst.msk [vmem:[%s585_s24] sm:$0xff] %vm632_vm0, %v1967_v60 }
 0x647   : > { %v1955_v58 = vpop.f32.mrb[24].mxu0 }
 0x648   : > { %v1966_v48 = vmul.f32 %v1964_v50, %v1955_v58  ;;  %v2360_v9 = vpop.f32.mrb[25].mxu0 }
 0x649   : > { %v1958_v11 = vpop.f32.mrb[26].mxu0 }
 0x64a   : > { %v1968_v19 = vadd.f32 %v1966_v48, %v1962_v16  ;;  %v2361_v39 = vpop.f32.mrb[27].mxu0 }
 0x64c   : > { %1970 = vst.msk [vmem:[%s585_s24 + $0x8] sm:$0xff] %vm632_vm0, %v1968_v19 }
 0x64d   : > { %2762 = shalt.err (!%p2759_p8)
}
 0x64e   : > { %s2763_s13 = scalar_lea.hbm %s3814_s27, 256  ;;  %s2767_s9 = scalar_lea.hbm %s3963_s11, 512 }
 0x64f   : > { %p2764_p10 = scmp.ne.s32.totalorder %s3814_s27, %s2763_s13  ;;  %p2768_p9 = scmp.lt.u32.totalorder %s3814_s27, %s3963_s11 }
 0x650   : > { %p2769_p4 = scmp.lt.u32.totalorder %s2767_s9, %s2763_s13  ;;  %p2771_p1 = scmp.lt.u32.totalorder %s2763_s13, %s3814_s27 }
 0x651   : > { %p2765_p0 = pnand %p2764_p10, %p3964_p5 }
 0x652   : > { %p2770_p6 = por %p2769_p4, %p2768_p9 }
 0x653   : > { %p2766_p12 = pneg %p2765_p0 }
 0x654   : > { %p2772_p11 = por %p2771_p1, %p2770_p6 }
 0x656   : > { %p2773_p13 = pnand %p2772_p11, %p2766_p12 }
 0x658   : > { %2776 = shalt.err (!%p2773_p13)
}
 0x659   : > { %s2848_s25 = smov 128   ;;  %s2849_s15 = smov 8  }
 0x65a   : > { %2386 = dma.vmem_to_hbm [thread:$0]  (%p3964_p5), %s3816_s8, 256, %s3814_s27, %s1972_s16, %s2848_s25, %s2848_s25, %s2849_s15  }
 0x65b PF: > { %s3965_s10 = sld [smem:[#allocation20_spill]]  ;;  %s3966_s24 = sld [smem:[#allocation26_spill]] }
 0x65c   : > { %p3968_p2 = scmp.ge.s32.totalorder %s2827_s20, 2 }
 0x661   : > { %s2000_s7 = sand.u32 1, %s3965_s10   ;;  %p3967_p7 = scmp.ne.s32.totalorder %s3966_s24, 0 }
 0x662   : > { %s2001_s14 = scalar_lea.sflag [#allocation4], %s2000_s7 }
 0x663   : > { %p2412_p3 = pnand %p3968_p2, %p3967_p7 }
 0x665   : > { %2810 = dma.done.wait (!%p2412_p3), %s2001_s14, 256  }
 0x666   : > { %2812 = vsyncadd (!%p2412_p3), %s2001_s14, 4294967040  ;;  %s3969_s20 = sld [smem:[#allocation23_spill]]  ;;  %s3970_s19 = sld [smem:[#allocation21_spill]] }
 0x667   : > { %s3971_s23 = sld [smem:[#allocation24_spill]]  ;;  %s3972_s17 = smov %s2819_s18 }
 0x66c   : > { %p31_p8 = scmp.ge.s32.totalorder %s3969_s20, 4   ;;  %s3973_s18 = smov %s3970_s19 }
 0x66d   : > { %s3974_s19 = smov %s3971_s23 }
 0x66e   :  { %33 = sbr.rel (!%p31_p8) target bundleno = 20 (0x14), region = 165 }
 0x675   :  { %2006 = vsyncpa [#allocation3], 1 }
 0x676   :  { %2008 = vsyncpa [#allocation3 + $0x1], 1 }
 0x677   :  { %2009 = vsyncpa [#allocation6], 1 }
 0x678   :  { %2011 = vsyncpa [#allocation6 + $0x1], 1 }
 0x679   :  { %2012 = vsyncpa [#allocation9], 1 }
 0x67a   :  { %2014 = vsyncpa [#allocation9 + $0x1], 1 }
 0x67b   :  { %2015 = vsyncpa [#allocation12], 1 }
 0x67c   :  { %2016 = vsyncpa [#allocation4], 1 }
 0x67d   :  { %2018 = vsyncpa [#allocation4 + $0x1], 1 }

</bundles_post_ra>
